<compile_context>
chip_gen: v7x
topology: tpu7x:2x2x1
jax: 0.10.0
libtpu: 0.0.40
codegen_flags: <defaults>
</compile_context>

<pallas_src>
import functools
import math

import jax
import jax.numpy as jnp
from jax.experimental import pallas as pl
from jax.experimental.pallas import tpu as pltpu

LN_EPS = 1e-5                         # PyTorch nn.LayerNorm default eps
GELU_C = math.sqrt(2.0 / math.pi)     # NewGELU constant

_LANE = 128
_TARGET_BLOCK_BYTES = 4 << 20         # aim ~4 MiB of x per grid step (memory-bound kernel)
_MIN_BLOCK_BYTES = 1 << 20            # never shrink blocks below ~1 MiB just to lengthen the grid
_LIVE_F32_INTERMEDIATES = 8           # conservative count of live (rows, Wp) f32 temporaries


def _cdiv(a, b):
    return -(-a // b)


def _round_up(a, b):
    return _cdiv(a, b) * b


def _new_gelu(x):
    # 0.5 * x * (1 + tanh(sqrt(2/pi) * (x + 0.044715 * x^3)))
    return 0.5 * x * (1.0 + jnp.tanh(GELU_C * (x + 0.044715 * x * x * x)))


def _layer_norm_1pass(x, gamma, beta, n_true):
    # Single-pass statistics: sum(x) and sum(x*x) are independent W-axis reductions
    # (no serialized subtract between them), and -- because any lane-padded columns of x
    # are exactly zero -- dividing by the TRUE width keeps the stats correct on padded
    # inputs.  var = E[x^2] - E[x]^2, clamped for numerical safety.
    inv_n = 1.0 / n_true
    s = jnp.sum(x, axis=-1, keepdims=True)
    s2 = jnp.sum(x * x, axis=-1, keepdims=True)
    mean = s * inv_n
    var = jnp.maximum(s2 * inv_n - mean * mean, 0.0)
    return (x - mean) * jax.lax.rsqrt(var + LN_EPS) * gamma + beta


def _layer_norm_ref(x, gamma, beta):
    # Two-pass, PyTorch-faithful form for the pure-JAX reference.
    mean = jnp.mean(x, axis=-1, keepdims=True)
    var = jnp.mean((x - mean) * (x - mean), axis=-1, keepdims=True)
    return (x - mean) * jax.lax.rsqrt(var + LN_EPS) * gamma + beta


def _attention_block_kernel(
    x_ref,            # (TB, S, Wp) input block (TB batch elements, lane-padded width)
    wa_ref, ba_ref,   # LiteAttention linear, pre-transposed bf16 (Wp, Wp); bias (1, Wp) f32
    g1_ref, b1_ref,   # ln1 gamma/beta: (1, Wp) f32
    g2_ref, b2_ref,   # ln2 gamma/beta: (1, Wp) f32
    w1_ref, bb1_ref,  # mlp linear 1, pre-transposed bf16 (Wp, Wp); bias (1, Wp)
    w2_ref, bb2_ref,  # mlp linear 2, pre-transposed bf16 (Wp, Wp); bias (1, Wp)
    o_ref,            # (TB, S, Wp) output block
    *, w_true, approx_softmax,
):
    TB, S, Wp = x_ref.shape
    x = x_ref[...].astype(jnp.float32)            # LN/softmax/GELU math in f32 (v5e-safe)
    # Merging the leading (TB, S) dims is layout-preserving (no VMEM relayout) when
    # S % 8 == 0; for awkward S Mosaic relayouts (still correct, just slower).
    x2d = x.reshape(TB * S, Wp)                   # tall M for the MXU

    # ----- ln1 -----
    x1 = _layer_norm_1pass(x2d, g1_ref[...], b1_ref[...], w_true)

    # ----- attn gate: x1 + x1 * softmax(Linear(x1), dim=seq) -----
    logits = jnp.dot(x1.astype(jnp.bfloat16), wa_ref[...],
                     preferred_element_type=jnp.float32) + ba_ref[...]
    logits3 = logits.reshape(TB, S, Wp)
    logits3 = logits3 - jnp.max(logits3, axis=1, keepdims=True)   # softmax over SEQUENCE
    e = jnp.exp(logits3)
    denom = jnp.sum(e, axis=1, keepdims=True)
    if approx_softmax:
        attn = e * pl.reciprocal(denom, approx=True)              # EUP reciprocal
    else:
        attn = e / denom
    x1_3 = x1.reshape(TB, S, Wp)
    x2 = (x1_3 + x1_3 * attn).reshape(TB * S, Wp)

    # ----- ln2 -----
    x3 = _layer_norm_1pass(x2, g2_ref[...], b2_ref[...], w_true)

    # ----- mlp: Linear -> NewGELU -> Linear -> Dropout(identity) -----
    # TODO(synk): Dropout is identity (eval mode); no RNG-based masking for training.
    h = _new_gelu(jnp.dot(x3.astype(jnp.bfloat16), w1_ref[...],
                          preferred_element_type=jnp.float32) + bb1_ref[...])
    m = jnp.dot(h.astype(jnp.bfloat16), w2_ref[...],
                preferred_element_type=jnp.float32) + bb2_ref[...]
    x4 = x3 + m

    # ----- final activation -----
    o_ref[...] = _new_gelu(x4).reshape(TB, S, Wp).astype(o_ref.dtype)


def _vmem_budget_bytes():
    cap = 128 << 20
    try:
        cap = int(pltpu.get_tpu_info().vmem_capacity_bytes)
    except Exception:          # API drift / non-TPU trace host -> conservative default
        pass
    # 75% of physical VMEM: ~48 MiB on v7x (64 MiB/TC), ~96 MiB on v5e/v6e (128 MiB).
    # Leaves headroom for compiler-internal scratch and semaphores.
    return (cap * 3) // 4


def _choose_tb(B, S, Wp, in_itemsize, out_itemsize, vmem_budget, weight_bytes):
    """Byte-based batch-chunk selection (not a fixed row cap)."""
    row_elems = S * Wp
    bx = row_elems * in_itemsize                                   # x bytes per batch element
    per_b = row_elems * (2 * in_itemsize + 2 * out_itemsize        # double-buffered in/out
                         + 4 * _LIVE_F32_INTERMEDIATES)            # live f32 temporaries
    cap = max(1, (vmem_budget - weight_bytes) // per_b)            # hard VMEM cap
    target = max(1, _TARGET_BLOCK_BYTES // max(bx, 1))             # aim ~4 MiB of x per step
    tb = int(max(1, min(B, cap, target)))
    # Prefer >= 4 grid steps (>= 2 per TensorCore on v7x with a 'parallel' batch axis)
    # so prefetch of step i+1 overlaps compute of step i -- but never shrink the block
    # below ~1 MiB of x to do it.
    while tb > 1 and _cdiv(B, tb) < 4 and (tb // 2) * bx >= _MIN_BLOCK_BYTES:
        tb //= 2
    return tb


def attention_block(x, params, *, tb=None, out_dtype=None, approx_softmax=True):
    """x: (B, S, W); params: dict of weights (see init_params).

    out_dtype defaults to x.dtype; pass jnp.bfloat16 (and/or a bf16 x) to halve
    activation HBM traffic -- internal LN/softmax/GELU math stays f32."""
    B, S, W = x.shape
    out_dtype = x.dtype if out_dtype is None else out_dtype

    # ---- lane-dense width: zero-pad W up to a multiple of 128 -------------------
    # Padded columns of x / weights / biases / LN affines are zero, so (with the
    # single-pass LN dividing by the true W) they stay exactly zero through every
    # stage and are sliced off at the end.  Trade-off: for W << 128 this adds HBM
    # traffic, but makes stores unmasked and MXU tiles full; no-op when W % 128 == 0.
    Wp = _round_up(W, _LANE)
    pad_w = Wp - W

    def pad_mat(w_t):   # pre-transposed (in, out) weight -> zero-pad both axes, bf16
        return jnp.pad(w_t, ((0, pad_w), (0, pad_w))).astype(jnp.bfloat16)

    def pad_vec(v):     # (1, W) -> (1, Wp) f32
        return jnp.pad(v, ((0, 0), (0, pad_w))).astype(jnp.float32)

    wa_t = pad_mat(params["wa"].T)
    w1_t = pad_mat(params["w1"].T)
    w2_t = pad_mat(params["w2"].T)
    ba, bb1, bb2 = pad_vec(params["ba"]), pad_vec(params["bb1"]), pad_vec(params["bb2"])
    g1, b1 = pad_vec(params["g1"]), pad_vec(params["b1"])
    g2, b2 = pad_vec(params["g2"]), pad_vec(params["b2"])

    # Worst-case resident weight footprint (double-buffered fallback path).
    weight_bytes = 2 * (3 * Wp * Wp * 2 + 7 * Wp * 4)

    in_itemsize = jnp.dtype(x.dtype).itemsize
    out_itemsize = jnp.dtype(out_dtype).itemsize
    budget = _vmem_budget_bytes()
    if tb is None:
        tb = _choose_tb(B, S, Wp, in_itemsize, out_itemsize, budget, weight_bytes)
    tb = int(max(1, min(tb, B)))

    # ---- pad batch so ANY tb works (no TB=1 fallback for awkward B) -------------
    B_pad = _round_up(B, tb)
    xp = x
    if B_pad != B or pad_w:
        xp = jnp.pad(x, ((0, B_pad - B), (0, 0), (0, pad_w)))

    grid = (B_pad // tb,)

    # ---- VMEM limit derived from actual block sizes, capped at 75% of physical ---
    est_vmem = weight_bytes + tb * S * Wp * (2 * in_itemsize + 2 * out_itemsize
                                             + 4 * _LIVE_F32_INTERMEDIATES)
    vmem_limit = int(min(budget, max(est_vmem + (8 << 20), 32 << 20)))

    # Advisory cost estimate for XLA's scheduler.
    flops = 3 * 2 * B_pad * S * Wp * Wp
    transcendentals = 4 * B_pad * S * Wp
    bytes_accessed = (B_pad * S * Wp * (in_itemsize + out_itemsize)
                      + 3 * Wp * Wp * 2 + 7 * Wp * 4)
    cost = pl.CostEstimate(flops=flops, transcendentals=transcendentals,
                           bytes_accessed=bytes_accessed)

    kern = functools.partial(_attention_block_kernel,
                             w_true=float(W), approx_softmax=approx_softmax)

    def build(single_buffer_weights):
        x_spec = pl.BlockSpec((tb, S, Wp), lambda b: (b, 0, 0))
        if single_buffer_weights and hasattr(pl, "Buffered"):
            # Constant-index weight/bias residents: single-buffered to halve their
            # VMEM footprint (they never change across the grid).
            mat_spec = pl.BlockSpec((Wp, Wp), lambda b: (0, 0),
                                    pipeline_mode=pl.Buffered(1))
            vec_spec = pl.BlockSpec((1, Wp), lambda b: (0, 0),
                                    pipeline_mode=pl.Buffered(1))
        else:
            mat_spec = pl.BlockSpec((Wp, Wp), lambda b: (0, 0))
            vec_spec = pl.BlockSpec((1, Wp), lambda b: (0, 0))
        return pl.pallas_call(
            kern,
            out_shape=jax.ShapeDtypeStruct((B_pad, S, Wp), out_dtype),
            grid_spec=pltpu.PrefetchScalarGridSpec(
                num_scalar_prefetch=0,
                grid=grid,
                in_specs=[
                    x_spec,
                    mat_spec, vec_spec,   # attn linear (pre-transposed) + bias
                    vec_spec, vec_spec,   # ln1
                    vec_spec, vec_spec,   # ln2
                    mat_spec, vec_spec,   # mlp linear 1
                    mat_spec, vec_spec,   # mlp linear 2
                ],
                out_specs=x_spec,
            ),
            compiler_params=pltpu.CompilerParams(
                dimension_semantics=("parallel",),
                vmem_limit_bytes=vmem_limit,
            ),
            cost_estimate=cost,
        )

    args = (xp, wa_t, ba, g1, b1, g2, b2, w1_t, bb1, w2_t, bb2)
    try:
        out = build(single_buffer_weights=True)(*args)
    except Exception:
        # pipeline_mode=pl.Buffered(1) unsupported on this jax/libtpu combo:
        # fall back to default double-buffered constant-index weight blocks.
        out = build(single_buffer_weights=False)(*args)

    if B_pad != B or pad_w:
        out = out[:B, :, :W]
    return out


def attention_block_ref(x, params, matmul_dtype=jnp.float32):
    """Pure-JAX reference mirroring the PyTorch forward (eval mode).
    matmul_dtype=jnp.bfloat16 mirrors the kernel's matmul precision."""
    def mm(a, w_t):
        return jnp.einsum("bsw,wo->bso",
                          a.astype(matmul_dtype), w_t.astype(matmul_dtype),
                          preferred_element_type=jnp.float32)

    wa_t, w1_t, w2_t = params["wa"].T, params["w1"].T, params["w2"].T
    x1 = _layer_norm_ref(x, params["g1"], params["b1"])
    attn = jax.nn.softmax(mm(x1, wa_t) + params["ba"], axis=1)   # dim=1 -> sequence
    x2 = x1 + x1 * attn
    x3 = _layer_norm_ref(x2, params["g2"], params["b2"])
    h = _new_gelu(mm(x3, w1_t) + params["bb1"])
    x4 = x3 + mm(h, w2_t) + params["bb2"]
    return _new_gelu(x4)


def init_params(key, width):
    """Deterministic synthetic parameter init (shapes match the PyTorch module)."""
    ks = jax.random.split(key, 8)
    scale = 1.0 / math.sqrt(width)
    return {
        "wa": jax.random.normal(ks[0], (width, width), jnp.float32) * scale,
        "ba": jax.random.normal(ks[1], (1, width), jnp.float32) * scale,
        "g1": 1.0 + 0.1 * jax.random.normal(ks[2], (1, width), jnp.float32),
        "b1": 0.1 * jax.random.normal(ks[3], (1, width), jnp.float32),
        "g2": 1.0 + 0.1 * jax.random.normal(ks[4], (1, width), jnp.float32),
        "b2": 0.1 * jax.random.normal(ks[5], (1, width), jnp.float32),
        "w1": jax.random.normal(ks[6], (width, width), jnp.float32) * scale,
        "bb1": jnp.zeros((1, width), jnp.float32),
        "w2": jax.random.normal(ks[7], (width, width), jnp.float32) * scale,
        "bb2": jnp.zeros((1, width), jnp.float32),
    }


if __name__ == "__main__":
    B, S, W = 4, 8, 32   # batch, seq, width
    key = jax.random.PRNGKey(0)
    kx, kp = jax.random.split(key)
    x = jax.random.normal(kx, (B, S, W), jnp.float32)
    params = init_params(kp, W)

    out = jax.block_until_ready(attention_block(x, params))
    assert out.shape == (B, S, W)

    # Tight check vs a reference with the same bf16 matmul precision as the kernel.
    ref_bf16 = attention_block_ref(x, params, matmul_dtype=jnp.bfloat16)
    assert jnp.allclose(out, ref_bf16, atol=1e-2, rtol=1e-2), "mismatch vs bf16-matmul reference"

    # Looser sanity check vs the fully-f32 PyTorch-faithful reference.
    ref_f32 = attention_block_ref(x, params, matmul_dtype=jnp.float32)
    assert jnp.allclose(out, ref_f32, atol=5e-2, rtol=5e-2), "mismatch vs f32 reference"

    # Exercise the reduced-precision activation I/O path (shape / finiteness only).
    out_bf16 = jax.block_until_ready(
        attention_block(x.astype(jnp.bfloat16), params, out_dtype=jnp.bfloat16))
    assert out_bf16.shape == (B, S, W) and bool(jnp.all(jnp.isfinite(out_bf16.astype(jnp.float32))))

    print("KERNEL_OK")
</pallas_src>

<mosaic_0001>
module attributes {stable_mosaic.version = 11 : i64} {
  func.func @_attention_block_kernel(%arg0: i32, %arg1: memref<4x8x128xf32, #tpu.memory_space<vmem>>, %arg2: memref<128x128xbf16, #tpu.memory_space<vmem>>, %arg3: memref<1x128xf32, #tpu.memory_space<vmem>>, %arg4: memref<1x128xf32, #tpu.memory_space<vmem>>, %arg5: memref<1x128xf32, #tpu.memory_space<vmem>>, %arg6: memref<1x128xf32, #tpu.memory_space<vmem>>, %arg7: memref<1x128xf32, #tpu.memory_space<vmem>>, %arg8: memref<128x128xbf16, #tpu.memory_space<vmem>>, %arg9: memref<1x128xf32, #tpu.memory_space<vmem>>, %arg10: memref<128x128xbf16, #tpu.memory_space<vmem>>, %arg11: memref<1x128xf32, #tpu.memory_space<vmem>>, %arg12: memref<4x8x128xf32, #tpu.memory_space<vmem>>) attributes {dimension_semantics = [#tpu.dimension_semantics<parallel>], iteration_bounds = array<i64: 1>, scalar_prefetch = 0 : i64, scratch_operands = 0 : i64, tpu.core_type = #tpu.core_type<tc>, window_params = [{transform_indices = @transform_0, window_bounds = array<i64: 4, 8, 128>}, {pipeline_mode = #tpu.pipeline_mode<synchronous>, transform_indices = @transform_1, window_bounds = array<i64: 128, 128>}, {pipeline_mode = #tpu.pipeline_mode<synchronous>, transform_indices = @transform_2, window_bounds = array<i64: 1, 128>}, {pipeline_mode = #tpu.pipeline_mode<synchronous>, transform_indices = @transform_3, window_bounds = array<i64: 1, 128>}, {pipeline_mode = #tpu.pipeline_mode<synchronous>, transform_indices = @transform_4, window_bounds = array<i64: 1, 128>}, {pipeline_mode = #tpu.pipeline_mode<synchronous>, transform_indices = @transform_5, window_bounds = array<i64: 1, 128>}, {pipeline_mode = #tpu.pipeline_mode<synchronous>, transform_indices = @transform_6, window_bounds = array<i64: 1, 128>}, {pipeline_mode = #tpu.pipeline_mode<synchronous>, transform_indices = @transform_7, window_bounds = array<i64: 128, 128>}, {pipeline_mode = #tpu.pipeline_mode<synchronous>, transform_indices = @transform_8, window_bounds = array<i64: 1, 128>}, {pipeline_mode = #tpu.pipeline_mode<synchronous>, transform_indices = @transform_9, window_bounds = array<i64: 128, 128>}, {pipeline_mode = #tpu.pipeline_mode<synchronous>, transform_indices = @transform_10, window_bounds = array<i64: 1, 128>}, {transform_indices = @transform_11, window_bounds = array<i64: 4, 8, 128>}]} {
    %c0 = arith.constant 0 : index
    %c0_0 = arith.constant 0 : index
    %c0_1 = arith.constant 0 : index
    %0 = vector.load %arg1[%c0, %c0_0, %c0_1] : memref<4x8x128xf32, #tpu.memory_space<vmem>>, vector<4x8x128xf32>
    %1 = vector.shape_cast %0 : vector<4x8x128xf32> to vector<32x128xf32>
    %c0_2 = arith.constant 0 : index
    %c0_3 = arith.constant 0 : index
    %2 = vector.load %arg4[%c0_2, %c0_3] : memref<1x128xf32, #tpu.memory_space<vmem>>, vector<1x128xf32>
    %c0_4 = arith.constant 0 : index
    %c0_5 = arith.constant 0 : index
    %3 = vector.load %arg5[%c0_4, %c0_5] : memref<1x128xf32, #tpu.memory_space<vmem>>, vector<1x128xf32>
    %cst = arith.constant dense<0.000000e+00> : vector<32xf32>
    %4 = vector.multi_reduction <add>, %1, %cst [1] : vector<32x128xf32> to vector<32xf32>
    %5 = vector.shape_cast %4 : vector<32xf32> to vector<32x1xf32>
    %6 = arith.mulf %1, %1 : vector<32x128xf32>
    %cst_6 = arith.constant dense<0.000000e+00> : vector<32xf32>
    %7 = vector.multi_reduction <add>, %6, %cst_6 [1] : vector<32x128xf32> to vector<32xf32>
    %8 = vector.shape_cast %7 : vector<32xf32> to vector<32x1xf32>
    %cst_7 = arith.constant 3.125000e-02 : f32
    %9 = vector.broadcast %cst_7 : f32 to vector<32x1xf32>
    %10 = arith.mulf %5, %9 : vector<32x1xf32>
    %cst_8 = arith.constant 3.125000e-02 : f32
    %11 = vector.broadcast %cst_8 : f32 to vector<32x1xf32>
    %12 = arith.mulf %8, %11 : vector<32x1xf32>
    %13 = arith.mulf %10, %10 : vector<32x1xf32>
    %14 = arith.subf %12, %13 : vector<32x1xf32>
    %cst_9 = arith.constant 0.000000e+00 : f32
    %15 = vector.broadcast %cst_9 : f32 to vector<32x1xf32>
    %16 = arith.maximumf %14, %15 : vector<32x1xf32>
    %17 = vector.broadcast %10 : vector<32x1xf32> to vector<32x128xf32>
    %18 = arith.subf %1, %17 : vector<32x128xf32>
    %cst_10 = arith.constant 9.99999974E-6 : f32
    %19 = vector.broadcast %cst_10 : f32 to vector<32x1xf32>
    %20 = arith.addf %16, %19 : vector<32x1xf32>
    %21 = math.rsqrt %20 : vector<32x1xf32>
    %22 = vector.broadcast %21 : vector<32x1xf32> to vector<32x128xf32>
    %23 = arith.mulf %18, %22 : vector<32x128xf32>
    %24 = vector.broadcast %2 : vector<1x128xf32> to vector<32x128xf32>
    %25 = arith.mulf %23, %24 : vector<32x128xf32>
    %26 = vector.broadcast %3 : vector<1x128xf32> to vector<32x128xf32>
    %27 = arith.addf %25, %26 : vector<32x128xf32>
    %28 = arith.truncf %27 : vector<32x128xf32> to vector<32x128xbf16>
    %c0_11 = arith.constant 0 : index
    %c0_12 = arith.constant 0 : index
    %29 = vector.load %arg2[%c0_11, %c0_12] : memref<128x128xbf16, #tpu.memory_space<vmem>>, vector<128x128xbf16>
    %cst_13 = arith.constant dense<0.000000e+00> : vector<32x128xf32>
    %30 = tpu.matmul %28, %29, %cst_13 {dimension_numbers = #tpu.dot_dimension_numbers<[1], [0], [0], [1], [0, 0, 1, 1], [], []>} : vector<32x128xbf16>, vector<128x128xbf16>, vector<32x128xf32> -> vector<32x128xf32>
    %c0_14 = arith.constant 0 : index
    %c0_15 = arith.constant 0 : index
    %31 = vector.load %arg3[%c0_14, %c0_15] : memref<1x128xf32, #tpu.memory_space<vmem>>, vector<1x128xf32>
    %32 = vector.broadcast %31 : vector<1x128xf32> to vector<32x128xf32>
    %33 = arith.addf %30, %32 : vector<32x128xf32>
    %34 = vector.shape_cast %33 : vector<32x128xf32> to vector<4x8x128xf32>
    %cst_16 = arith.constant dense<0xFF800000> : vector<4x128xf32>
    %35 = vector.multi_reduction <maximumf>, %34, %cst_16 [1] : vector<4x8x128xf32> to vector<4x128xf32>
    %36 = vector.shape_cast %35 : vector<4x128xf32> to vector<4x1x128xf32>
    %37 = vector.broadcast %36 : vector<4x1x128xf32> to vector<4x8x128xf32>
    %38 = arith.subf %34, %37 : vector<4x8x128xf32>
    %39 = math.exp %38 : vector<4x8x128xf32>
    %cst_17 = arith.constant dense<0.000000e+00> : vector<4x128xf32>
    %40 = vector.multi_reduction <add>, %39, %cst_17 [1] : vector<4x8x128xf32> to vector<4x128xf32>
    %41 = vector.shape_cast %40 : vector<4x128xf32> to vector<4x1x128xf32>
    %42 = tpu.reciprocal %41 {approx = true} : vector<4x1x128xf32> -> vector<4x1x128xf32>
    %43 = vector.broadcast %42 : vector<4x1x128xf32> to vector<4x8x128xf32>
    %44 = arith.mulf %39, %43 : vector<4x8x128xf32>
    %45 = vector.shape_cast %27 : vector<32x128xf32> to vector<4x8x128xf32>
    %46 = arith.mulf %45, %44 : vector<4x8x128xf32>
    %47 = arith.addf %45, %46 : vector<4x8x128xf32>
    %48 = vector.shape_cast %47 : vector<4x8x128xf32> to vector<32x128xf32>
    %c0_18 = arith.constant 0 : index
    %c0_19 = arith.constant 0 : index
    %49 = vector.load %arg6[%c0_18, %c0_19] : memref<1x128xf32, #tpu.memory_space<vmem>>, vector<1x128xf32>
    %c0_20 = arith.constant 0 : index
    %c0_21 = arith.constant 0 : index
    %50 = vector.load %arg7[%c0_20, %c0_21] : memref<1x128xf32, #tpu.memory_space<vmem>>, vector<1x128xf32>
    %cst_22 = arith.constant dense<0.000000e+00> : vector<32xf32>
    %51 = vector.multi_reduction <add>, %48, %cst_22 [1] : vector<32x128xf32> to vector<32xf32>
    %52 = vector.shape_cast %51 : vector<32xf32> to vector<32x1xf32>
    %53 = arith.mulf %48, %48 : vector<32x128xf32>
    %cst_23 = arith.constant dense<0.000000e+00> : vector<32xf32>
    %54 = vector.multi_reduction <add>, %53, %cst_23 [1] : vector<32x128xf32> to vector<32xf32>
    %55 = vector.shape_cast %54 : vector<32xf32> to vector<32x1xf32>
    %cst_24 = arith.constant 3.125000e-02 : f32
    %56 = vector.broadcast %cst_24 : f32 to vector<32x1xf32>
    %57 = arith.mulf %52, %56 : vector<32x1xf32>
    %cst_25 = arith.constant 3.125000e-02 : f32
    %58 = vector.broadcast %cst_25 : f32 to vector<32x1xf32>
    %59 = arith.mulf %55, %58 : vector<32x1xf32>
    %60 = arith.mulf %57, %57 : vector<32x1xf32>
    %61 = arith.subf %59, %60 : vector<32x1xf32>
    %cst_26 = arith.constant 0.000000e+00 : f32
    %62 = vector.broadcast %cst_26 : f32 to vector<32x1xf32>
    %63 = arith.maximumf %61, %62 : vector<32x1xf32>
    %64 = vector.broadcast %57 : vector<32x1xf32> to vector<32x128xf32>
    %65 = arith.subf %48, %64 : vector<32x128xf32>
    %cst_27 = arith.constant 9.99999974E-6 : f32
    %66 = vector.broadcast %cst_27 : f32 to vector<32x1xf32>
    %67 = arith.addf %63, %66 : vector<32x1xf32>
    %68 = math.rsqrt %67 : vector<32x1xf32>
    %69 = vector.broadcast %68 : vector<32x1xf32> to vector<32x128xf32>
    %70 = arith.mulf %65, %69 : vector<32x128xf32>
    %71 = vector.broadcast %49 : vector<1x128xf32> to vector<32x128xf32>
    %72 = arith.mulf %70, %71 : vector<32x128xf32>
    %73 = vector.broadcast %50 : vector<1x128xf32> to vector<32x128xf32>
    %74 = arith.addf %72, %73 : vector<32x128xf32>
    %75 = arith.truncf %74 : vector<32x128xf32> to vector<32x128xbf16>
    %c0_28 = arith.constant 0 : index
    %c0_29 = arith.constant 0 : index
    %76 = vector.load %arg8[%c0_28, %c0_29] : memref<128x128xbf16, #tpu.memory_space<vmem>>, vector<128x128xbf16>
    %cst_30 = arith.constant dense<0.000000e+00> : vector<32x128xf32>
    %77 = tpu.matmul %75, %76, %cst_30 {dimension_numbers = #tpu.dot_dimension_numbers<[1], [0], [0], [1], [0, 0, 1, 1], [], []>} : vector<32x128xbf16>, vector<128x128xbf16>, vector<32x128xf32> -> vector<32x128xf32>
    %c0_31 = arith.constant 0 : index
    %c0_32 = arith.constant 0 : index
    %78 = vector.load %arg9[%c0_31, %c0_32] : memref<1x128xf32, #tpu.memory_space<vmem>>, vector<1x128xf32>
    %79 = vector.broadcast %78 : vector<1x128xf32> to vector<32x128xf32>
    %80 = arith.addf %77, %79 : vector<32x128xf32>
    %cst_33 = arith.constant 5.000000e-01 : f32
    %81 = vector.broadcast %cst_33 : f32 to vector<32x128xf32>
    %82 = arith.mulf %81, %80 : vector<32x128xf32>
    %cst_34 = arith.constant 4.471500e-02 : f32
    %83 = vector.broadcast %cst_34 : f32 to vector<32x128xf32>
    %84 = arith.mulf %83, %80 : vector<32x128xf32>
    %85 = arith.mulf %84, %80 : vector<32x128xf32>
    %86 = arith.mulf %85, %80 : vector<32x128xf32>
    %87 = arith.addf %80, %86 : vector<32x128xf32>
    %cst_35 = arith.constant 0.797884583 : f32
    %88 = vector.broadcast %cst_35 : f32 to vector<32x128xf32>
    %89 = arith.mulf %88, %87 : vector<32x128xf32>
    %90 = math.tanh %89 : vector<32x128xf32>
    %cst_36 = arith.constant 1.000000e+00 : f32
    %91 = vector.broadcast %cst_36 : f32 to vector<32x128xf32>
    %92 = arith.addf %91, %90 : vector<32x128xf32>
    %93 = arith.mulf %82, %92 : vector<32x128xf32>
    %94 = arith.truncf %93 : vector<32x128xf32> to vector<32x128xbf16>
    %c0_37 = arith.constant 0 : index
    %c0_38 = arith.constant 0 : index
    %95 = vector.load %arg10[%c0_37, %c0_38] : memref<128x128xbf16, #tpu.memory_space<vmem>>, vector<128x128xbf16>
    %cst_39 = arith.constant dense<0.000000e+00> : vector<32x128xf32>
    %96 = tpu.matmul %94, %95, %cst_39 {dimension_numbers = #tpu.dot_dimension_numbers<[1], [0], [0], [1], [0, 0, 1, 1], [], []>} : vector<32x128xbf16>, vector<128x128xbf16>, vector<32x128xf32> -> vector<32x128xf32>
    %c0_40 = arith.constant 0 : index
    %c0_41 = arith.constant 0 : index
    %97 = vector.load %arg11[%c0_40, %c0_41] : memref<1x128xf32, #tpu.memory_space<vmem>>, vector<1x128xf32>
    %98 = vector.broadcast %97 : vector<1x128xf32> to vector<32x128xf32>
    %99 = arith.addf %96, %98 : vector<32x128xf32>
    %100 = arith.addf %74, %99 : vector<32x128xf32>
    %cst_42 = arith.constant 5.000000e-01 : f32
    %101 = vector.broadcast %cst_42 : f32 to vector<32x128xf32>
    %102 = arith.mulf %101, %100 : vector<32x128xf32>
    %cst_43 = arith.constant 4.471500e-02 : f32
    %103 = vector.broadcast %cst_43 : f32 to vector<32x128xf32>
    %104 = arith.mulf %103, %100 : vector<32x128xf32>
    %105 = arith.mulf %104, %100 : vector<32x128xf32>
    %106 = arith.mulf %105, %100 : vector<32x128xf32>
    %107 = arith.addf %100, %106 : vector<32x128xf32>
    %cst_44 = arith.constant 0.797884583 : f32
    %108 = vector.broadcast %cst_44 : f32 to vector<32x128xf32>
    %109 = arith.mulf %108, %107 : vector<32x128xf32>
    %110 = math.tanh %109 : vector<32x128xf32>
    %cst_45 = arith.constant 1.000000e+00 : f32
    %111 = vector.broadcast %cst_45 : f32 to vector<32x128xf32>
    %112 = arith.addf %111, %110 : vector<32x128xf32>
    %113 = arith.mulf %102, %112 : vector<32x128xf32>
    %114 = vector.shape_cast %113 : vector<32x128xf32> to vector<4x8x128xf32>
    %c0_46 = arith.constant 0 : index
    %c0_47 = arith.constant 0 : index
    %c0_48 = arith.constant 0 : index
    %115 = vector.load %arg12[%c0_46, %c0_47, %c0_48] : memref<4x8x128xf32, #tpu.memory_space<vmem>>, vector<4x8x128xf32>
    tpu.vector_store %arg12[%c0_46, %c0_47, %c0_48], %114 {strides = array<i32>} : memref<4x8x128xf32, #tpu.memory_space<vmem>>, vector<4x8x128xf32>,
    return
  }
  func.func @transform_0(%arg0: i32) -> (i32, i32, i32) {
    %c0_i32 = arith.constant 0 : i32
    %c0_i32_0 = arith.constant 0 : i32
    %c0_i32_1 = arith.constant 0 : i32
    return %arg0, %c0_i32, %c0_i32_0 : i32, i32, i32
  }
  func.func @transform_1(%arg0: i32) -> (i32, i32) {
    %c0_i32 = arith.constant 0 : i32
    %c0_i32_0 = arith.constant 0 : i32
    %c0_i32_1 = arith.constant 0 : i32
    return %c0_i32, %c0_i32_0 : i32, i32
  }
  func.func @transform_2(%arg0: i32) -> (i32, i32) {
    %c0_i32 = arith.constant 0 : i32
    %c0_i32_0 = arith.constant 0 : i32
    %c0_i32_1 = arith.constant 0 : i32
    return %c0_i32, %c0_i32_0 : i32, i32
  }
  func.func @transform_3(%arg0: i32) -> (i32, i32) {
    %c0_i32 = arith.constant 0 : i32
    %c0_i32_0 = arith.constant 0 : i32
    %c0_i32_1 = arith.constant 0 : i32
    return %c0_i32, %c0_i32_0 : i32, i32
  }
  func.func @transform_4(%arg0: i32) -> (i32, i32) {
    %c0_i32 = arith.constant 0 : i32
    %c0_i32_0 = arith.constant 0 : i32
    %c0_i32_1 = arith.constant 0 : i32
    return %c0_i32, %c0_i32_0 : i32, i32
  }
  func.func @transform_5(%arg0: i32) -> (i32, i32) {
    %c0_i32 = arith.constant 0 : i32
    %c0_i32_0 = arith.constant 0 : i32
    %c0_i32_1 = arith.constant 0 : i32
    return %c0_i32, %c0_i32_0 : i32, i32
  }
  func.func @transform_6(%arg0: i32) -> (i32, i32) {
    %c0_i32 = arith.constant 0 : i32
    %c0_i32_0 = arith.constant 0 : i32
    %c0_i32_1 = arith.constant 0 : i32
    return %c0_i32, %c0_i32_0 : i32, i32
  }
  func.func @transform_7(%arg0: i32) -> (i32, i32) {
    %c0_i32 = arith.constant 0 : i32
    %c0_i32_0 = arith.constant 0 : i32
    %c0_i32_1 = arith.constant 0 : i32
    return %c0_i32, %c0_i32_0 : i32, i32
  }
  func.func @transform_8(%arg0: i32) -> (i32, i32) {
    %c0_i32 = arith.constant 0 : i32
    %c0_i32_0 = arith.constant 0 : i32
    %c0_i32_1 = arith.constant 0 : i32
    return %c0_i32, %c0_i32_0 : i32, i32
  }
  func.func @transform_9(%arg0: i32) -> (i32, i32) {
    %c0_i32 = arith.constant 0 : i32
    %c0_i32_0 = arith.constant 0 : i32
    %c0_i32_1 = arith.constant 0 : i32
    return %c0_i32, %c0_i32_0 : i32, i32
  }
  func.func @transform_10(%arg0: i32) -> (i32, i32) {
    %c0_i32 = arith.constant 0 : i32
    %c0_i32_0 = arith.constant 0 : i32
    %c0_i32_1 = arith.constant 0 : i32
    return %c0_i32, %c0_i32_0 : i32, i32
  }
  func.func @transform_11(%arg0: i32) -> (i32, i32, i32) {
    %c0_i32 = arith.constant 0 : i32
    %c0_i32_0 = arith.constant 0 : i32
    %c0_i32_1 = arith.constant 0 : i32
    return %arg0, %c0_i32, %c0_i32_0 : i32, i32, i32
  }
}

module attributes {stable_mosaic.version = 11 : i64} {
  func.func @_attention_block_kernel(%arg0: i32, %arg1: memref<4x8x128xf32, #tpu.memory_space<vmem>>, %arg2: memref<128x128xbf16, #tpu.memory_space<vmem>>, %arg3: memref<1x128xf32, #tpu.memory_space<vmem>>, %arg4: memref<1x128xf32, #tpu.memory_space<vmem>>, %arg5: memref<1x128xf32, #tpu.memory_space<vmem>>, %arg6: memref<1x128xf32, #tpu.memory_space<vmem>>, %arg7: memref<1x128xf32, #tpu.memory_space<vmem>>, %arg8: memref<128x128xbf16, #tpu.memory_space<vmem>>, %arg9: memref<1x128xf32, #tpu.memory_space<vmem>>, %arg10: memref<128x128xbf16, #tpu.memory_space<vmem>>, %arg11: memref<1x128xf32, #tpu.memory_space<vmem>>, %arg12: memref<4x8x128xf32, #tpu.memory_space<vmem>>) attributes {dimension_semantics = [#tpu.dimension_semantics<parallel>], iteration_bounds = array<i64: 1>, scalar_prefetch = 0 : i64, scratch_operands = 0 : i64, tpu.core_type = #tpu.core_type<tc>, window_params = [{transform_indices = @transform_0, window_bounds = array<i64: 4, 8, 128>}, {pipeline_mode = #tpu.pipeline_mode<synchronous>, transform_indices = @transform_1, window_bounds = array<i64: 128, 128>}, {pipeline_mode = #tpu.pipeline_mode<synchronous>, transform_indices = @transform_2, window_bounds = array<i64: 1, 128>}, {pipeline_mode = #tpu.pipeline_mode<synchronous>, transform_indices = @transform_3, window_bounds = array<i64: 1, 128>}, {pipeline_mode = #tpu.pipeline_mode<synchronous>, transform_indices = @transform_4, window_bounds = array<i64: 1, 128>}, {pipeline_mode = #tpu.pipeline_mode<synchronous>, transform_indices = @transform_5, window_bounds = array<i64: 1, 128>}, {pipeline_mode = #tpu.pipeline_mode<synchronous>, transform_indices = @transform_6, window_bounds = array<i64: 1, 128>}, {pipeline_mode = #tpu.pipeline_mode<synchronous>, transform_indices = @transform_7, window_bounds = array<i64: 128, 128>}, {pipeline_mode = #tpu.pipeline_mode<synchronous>, transform_indices = @transform_8, window_bounds = array<i64: 1, 128>}, {pipeline_mode = #tpu.pipeline_mode<synchronous>, transform_indices = @transform_9, window_bounds = array<i64: 128, 128>}, {pipeline_mode = #tpu.pipeline_mode<synchronous>, transform_indices = @transform_10, window_bounds = array<i64: 1, 128>}, {transform_indices = @transform_11, window_bounds = array<i64: 4, 8, 128>}]} {
    %c0 = arith.constant 0 : index
    %c0_0 = arith.constant 0 : index
    %c0_1 = arith.constant 0 : index
    %0 = vector.load %arg1[%c0, %c0_0, %c0_1] : memref<4x8x128xf32, #tpu.memory_space<vmem>>, vector<4x8x128xf32>
    %1 = vector.shape_cast %0 : vector<4x8x128xf32> to vector<32x128xf32>
    %c0_2 = arith.constant 0 : index
    %c0_3 = arith.constant 0 : index
    %2 = vector.load %arg4[%c0_2, %c0_3] : memref<1x128xf32, #tpu.memory_space<vmem>>, vector<1x128xf32>
    %c0_4 = arith.constant 0 : index
    %c0_5 = arith.constant 0 : index
    %3 = vector.load %arg5[%c0_4, %c0_5] : memref<1x128xf32, #tpu.memory_space<vmem>>, vector<1x128xf32>
    %cst = arith.constant dense<0.000000e+00> : vector<32xf32>
    %4 = vector.multi_reduction <add>, %1, %cst [1] : vector<32x128xf32> to vector<32xf32>
    %5 = vector.shape_cast %4 : vector<32xf32> to vector<32x1xf32>
    %6 = arith.mulf %1, %1 : vector<32x128xf32>
    %cst_6 = arith.constant dense<0.000000e+00> : vector<32xf32>
    %7 = vector.multi_reduction <add>, %6, %cst_6 [1] : vector<32x128xf32> to vector<32xf32>
    %8 = vector.shape_cast %7 : vector<32xf32> to vector<32x1xf32>
    %cst_7 = arith.constant 3.125000e-02 : f32
    %9 = vector.broadcast %cst_7 : f32 to vector<32x1xf32>
    %10 = arith.mulf %5, %9 : vector<32x1xf32>
    %cst_8 = arith.constant 3.125000e-02 : f32
    %11 = vector.broadcast %cst_8 : f32 to vector<32x1xf32>
    %12 = arith.mulf %8, %11 : vector<32x1xf32>
    %13 = arith.mulf %10, %10 : vector<32x1xf32>
    %14 = arith.subf %12, %13 : vector<32x1xf32>
    %cst_9 = arith.constant 0.000000e+00 : f32
    %15 = vector.broadcast %cst_9 : f32 to vector<32x1xf32>
    %16 = arith.maximumf %14, %15 : vector<32x1xf32>
    %17 = vector.broadcast %10 : vector<32x1xf32> to vector<32x128xf32>
    %18 = arith.subf %1, %17 : vector<32x128xf32>
    %cst_10 = arith.constant 9.99999974E-6 : f32
    %19 = vector.broadcast %cst_10 : f32 to vector<32x1xf32>
    %20 = arith.addf %16, %19 : vector<32x1xf32>
    %21 = math.rsqrt %20 : vector<32x1xf32>
    %22 = vector.broadcast %21 : vector<32x1xf32> to vector<32x128xf32>
    %23 = arith.mulf %18, %22 : vector<32x128xf32>
    %24 = vector.broadcast %2 : vector<1x128xf32> to vector<32x128xf32>
    %25 = arith.mulf %23, %24 : vector<32x128xf32>
    %26 = vector.broadcast %3 : vector<1x128xf32> to vector<32x128xf32>
    %27 = arith.addf %25, %26 : vector<32x128xf32>
    %28 = arith.truncf %27 : vector<32x128xf32> to vector<32x128xbf16>
    %c0_11 = arith.constant 0 : index
    %c0_12 = arith.constant 0 : index
    %29 = vector.load %arg2[%c0_11, %c0_12] : memref<128x128xbf16, #tpu.memory_space<vmem>>, vector<128x128xbf16>
    %cst_13 = arith.constant dense<0.000000e+00> : vector<32x128xf32>
    %30 = tpu.matmul %28, %29, %cst_13 {dimension_numbers = #tpu.dot_dimension_numbers<[1], [0], [0], [1], [0, 0, 1, 1], [], []>} : vector<32x128xbf16>, vector<128x128xbf16>, vector<32x128xf32> -> vector<32x128xf32>
    %c0_14 = arith.constant 0 : index
    %c0_15 = arith.constant 0 : index
    %31 = vector.load %arg3[%c0_14, %c0_15] : memref<1x128xf32, #tpu.memory_space<vmem>>, vector<1x128xf32>
    %32 = vector.broadcast %31 : vector<1x128xf32> to vector<32x128xf32>
    %33 = arith.addf %30, %32 : vector<32x128xf32>
    %34 = vector.shape_cast %33 : vector<32x128xf32> to vector<4x8x128xf32>
    %cst_16 = arith.constant dense<0xFF800000> : vector<4x128xf32>
    %35 = vector.multi_reduction <maximumf>, %34, %cst_16 [1] : vector<4x8x128xf32> to vector<4x128xf32>
    %36 = vector.shape_cast %35 : vector<4x128xf32> to vector<4x1x128xf32>
    %37 = vector.broadcast %36 : vector<4x1x128xf32> to vector<4x8x128xf32>
    %38 = arith.subf %34, %37 : vector<4x8x128xf32>
    %39 = math.exp %38 : vector<4x8x128xf32>
    %cst_17 = arith.constant dense<0.000000e+00> : vector<4x128xf32>
    %40 = vector.multi_reduction <add>, %39, %cst_17 [1] : vector<4x8x128xf32> to vector<4x128xf32>
    %41 = vector.shape_cast %40 : vector<4x128xf32> to vector<4x1x128xf32>
    %42 = tpu.reciprocal %41 {approx = true} : vector<4x1x128xf32> -> vector<4x1x128xf32>
    %43 = vector.broadcast %42 : vector<4x1x128xf32> to vector<4x8x128xf32>
    %44 = arith.mulf %39, %43 : vector<4x8x128xf32>
    %45 = vector.shape_cast %27 : vector<32x128xf32> to vector<4x8x128xf32>
    %46 = arith.mulf %45, %44 : vector<4x8x128xf32>
    %47 = arith.addf %45, %46 : vector<4x8x128xf32>
    %48 = vector.shape_cast %47 : vector<4x8x128xf32> to vector<32x128xf32>
    %c0_18 = arith.constant 0 : index
    %c0_19 = arith.constant 0 : index
    %49 = vector.load %arg6[%c0_18, %c0_19] : memref<1x128xf32, #tpu.memory_space<vmem>>, vector<1x128xf32>
    %c0_20 = arith.constant 0 : index
    %c0_21 = arith.constant 0 : index
    %50 = vector.load %arg7[%c0_20, %c0_21] : memref<1x128xf32, #tpu.memory_space<vmem>>, vector<1x128xf32>
    %cst_22 = arith.constant dense<0.000000e+00> : vector<32xf32>
    %51 = vector.multi_reduction <add>, %48, %cst_22 [1] : vector<32x128xf32> to vector<32xf32>
    %52 = vector.shape_cast %51 : vector<32xf32> to vector<32x1xf32>
    %53 = arith.mulf %48, %48 : vector<32x128xf32>
    %cst_23 = arith.constant dense<0.000000e+00> : vector<32xf32>
    %54 = vector.multi_reduction <add>, %53, %cst_23 [1] : vector<32x128xf32> to vector<32xf32>
    %55 = vector.shape_cast %54 : vector<32xf32> to vector<32x1xf32>
    %cst_24 = arith.constant 3.125000e-02 : f32
    %56 = vector.broadcast %cst_24 : f32 to vector<32x1xf32>
    %57 = arith.mulf %52, %56 : vector<32x1xf32>
    %cst_25 = arith.constant 3.125000e-02 : f32
    %58 = vector.broadcast %cst_25 : f32 to vector<32x1xf32>
    %59 = arith.mulf %55, %58 : vector<32x1xf32>
    %60 = arith.mulf %57, %57 : vector<32x1xf32>
    %61 = arith.subf %59, %60 : vector<32x1xf32>
    %cst_26 = arith.constant 0.000000e+00 : f32
    %62 = vector.broadcast %cst_26 : f32 to vector<32x1xf32>
    %63 = arith.maximumf %61, %62 : vector<32x1xf32>
    %64 = vector.broadcast %57 : vector<32x1xf32> to vector<32x128xf32>
    %65 = arith.subf %48, %64 : vector<32x128xf32>
    %cst_27 = arith.constant 9.99999974E-6 : f32
    %66 = vector.broadcast %cst_27 : f32 to vector<32x1xf32>
    %67 = arith.addf %63, %66 : vector<32x1xf32>
    %68 = math.rsqrt %67 : vector<32x1xf32>
    %69 = vector.broadcast %68 : vector<32x1xf32> to vector<32x128xf32>
    %70 = arith.mulf %65, %69 : vector<32x128xf32>
    %71 = vector.broadcast %49 : vector<1x128xf32> to vector<32x128xf32>
    %72 = arith.mulf %70, %71 : vector<32x128xf32>
    %73 = vector.broadcast %50 : vector<1x128xf32> to vector<32x128xf32>
    %74 = arith.addf %72, %73 : vector<32x128xf32>
    %75 = arith.truncf %74 : vector<32x128xf32> to vector<32x128xbf16>
    %c0_28 = arith.constant 0 : index
    %c0_29 = arith.constant 0 : index
    %76 = vector.load %arg8[%c0_28, %c0_29] : memref<128x128xbf16, #tpu.memory_space<vmem>>, vector<128x128xbf16>
    %cst_30 = arith.constant dense<0.000000e+00> : vector<32x128xf32>
    %77 = tpu.matmul %75, %76, %cst_30 {dimension_numbers = #tpu.dot_dimension_numbers<[1], [0], [0], [1], [0, 0, 1, 1], [], []>} : vector<32x128xbf16>, vector<128x128xbf16>, vector<32x128xf32> -> vector<32x128xf32>
    %c0_31 = arith.constant 0 : index
    %c0_32 = arith.constant 0 : index
    %78 = vector.load %arg9[%c0_31, %c0_32] : memref<1x128xf32, #tpu.memory_space<vmem>>, vector<1x128xf32>
    %79 = vector.broadcast %78 : vector<1x128xf32> to vector<32x128xf32>
    %80 = arith.addf %77, %79 : vector<32x128xf32>
    %cst_33 = arith.constant 5.000000e-01 : f32
    %81 = vector.broadcast %cst_33 : f32 to vector<32x128xf32>
    %82 = arith.mulf %81, %80 : vector<32x128xf32>
    %cst_34 = arith.constant 4.471500e-02 : f32
    %83 = vector.broadcast %cst_34 : f32 to vector<32x128xf32>
    %84 = arith.mulf %83, %80 : vector<32x128xf32>
    %85 = arith.mulf %84, %80 : vector<32x128xf32>
    %86 = arith.mulf %85, %80 : vector<32x128xf32>
    %87 = arith.addf %80, %86 : vector<32x128xf32>
    %cst_35 = arith.constant 0.797884583 : f32
    %88 = vector.broadcast %cst_35 : f32 to vector<32x128xf32>
    %89 = arith.mulf %88, %87 : vector<32x128xf32>
    %90 = math.tanh %89 : vector<32x128xf32>
    %cst_36 = arith.constant 1.000000e+00 : f32
    %91 = vector.broadcast %cst_36 : f32 to vector<32x128xf32>
    %92 = arith.addf %91, %90 : vector<32x128xf32>
    %93 = arith.mulf %82, %92 : vector<32x128xf32>
    %94 = arith.truncf %93 : vector<32x128xf32> to vector<32x128xbf16>
    %c0_37 = arith.constant 0 : index
    %c0_38 = arith.constant 0 : index
    %95 = vector.load %arg10[%c0_37, %c0_38] : memref<128x128xbf16, #tpu.memory_space<vmem>>, vector<128x128xbf16>
    %cst_39 = arith.constant dense<0.000000e+00> : vector<32x128xf32>
    %96 = tpu.matmul %94, %95, %cst_39 {dimension_numbers = #tpu.dot_dimension_numbers<[1], [0], [0], [1], [0, 0, 1, 1], [], []>} : vector<32x128xbf16>, vector<128x128xbf16>, vector<32x128xf32> -> vector<32x128xf32>
    %c0_40 = arith.constant 0 : index
    %c0_41 = arith.constant 0 : index
    %97 = vector.load %arg11[%c0_40, %c0_41] : memref<1x128xf32, #tpu.memory_space<vmem>>, vector<1x128xf32>
    %98 = vector.broadcast %97 : vector<1x128xf32> to vector<32x128xf32>
    %99 = arith.addf %96, %98 : vector<32x128xf32>
    %100 = arith.addf %74, %99 : vector<32x128xf32>
    %cst_42 = arith.constant 5.000000e-01 : f32
    %101 = vector.broadcast %cst_42 : f32 to vector<32x128xf32>
    %102 = arith.mulf %101, %100 : vector<32x128xf32>
    %cst_43 = arith.constant 4.471500e-02 : f32
    %103 = vector.broadcast %cst_43 : f32 to vector<32x128xf32>
    %104 = arith.mulf %103, %100 : vector<32x128xf32>
    %105 = arith.mulf %104, %100 : vector<32x128xf32>
    %106 = arith.mulf %105, %100 : vector<32x128xf32>
    %107 = arith.addf %100, %106 : vector<32x128xf32>
    %cst_44 = arith.constant 0.797884583 : f32
    %108 = vector.broadcast %cst_44 : f32 to vector<32x128xf32>
    %109 = arith.mulf %108, %107 : vector<32x128xf32>
    %110 = math.tanh %109 : vector<32x128xf32>
    %cst_45 = arith.constant 1.000000e+00 : f32
    %111 = vector.broadcast %cst_45 : f32 to vector<32x128xf32>
    %112 = arith.addf %111, %110 : vector<32x128xf32>
    %113 = arith.mulf %102, %112 : vector<32x128xf32>
    %114 = vector.shape_cast %113 : vector<32x128xf32> to vector<4x8x128xf32>
    %c0_46 = arith.constant 0 : index
    %c0_47 = arith.constant 0 : index
    %c0_48 = arith.constant 0 : index
    %115 = vector.load %arg12[%c0_46, %c0_47, %c0_48] : memref<4x8x128xf32, #tpu.memory_space<vmem>>, vector<4x8x128xf32>
    tpu.vector_store %arg12[%c0_46, %c0_47, %c0_48], %114 {strides = array<i32>} : memref<4x8x128xf32, #tpu.memory_space<vmem>>, vector<4x8x128xf32>,
    return
  }
  func.func @transform_0(%arg0: i32) -> (i32, i32, i32) {
    %c0_i32 = arith.constant 0 : i32
    %c0_i32_0 = arith.constant 0 : i32
    %c0_i32_1 = arith.constant 0 : i32
    return %arg0, %c0_i32, %c0_i32_0 : i32, i32, i32
  }
  func.func @transform_1(%arg0: i32) -> (i32, i32) {
    %c0_i32 = arith.constant 0 : i32
    %c0_i32_0 = arith.constant 0 : i32
    %c0_i32_1 = arith.constant 0 : i32
    return %c0_i32, %c0_i32_0 : i32, i32
  }
  func.func @transform_2(%arg0: i32) -> (i32, i32) {
    %c0_i32 = arith.constant 0 : i32
    %c0_i32_0 = arith.constant 0 : i32
    %c0_i32_1 = arith.constant 0 : i32
    return %c0_i32, %c0_i32_0 : i32, i32
  }
  func.func @transform_3(%arg0: i32) -> (i32, i32) {
    %c0_i32 = arith.constant 0 : i32
    %c0_i32_0 = arith.constant 0 : i32
    %c0_i32_1 = arith.constant 0 : i32
    return %c0_i32, %c0_i32_0 : i32, i32
  }
  func.func @transform_4(%arg0: i32) -> (i32, i32) {
    %c0_i32 = arith.constant 0 : i32
    %c0_i32_0 = arith.constant 0 : i32
    %c0_i32_1 = arith.constant 0 : i32
    return %c0_i32, %c0_i32_0 : i32, i32
  }
  func.func @transform_5(%arg0: i32) -> (i32, i32) {
    %c0_i32 = arith.constant 0 : i32
    %c0_i32_0 = arith.constant 0 : i32
    %c0_i32_1 = arith.constant 0 : i32
    return %c0_i32, %c0_i32_0 : i32, i32
  }
  func.func @transform_6(%arg0: i32) -> (i32, i32) {
    %c0_i32 = arith.constant 0 : i32
    %c0_i32_0 = arith.constant 0 : i32
    %c0_i32_1 = arith.constant 0 : i32
    return %c0_i32, %c0_i32_0 : i32, i32
  }
  func.func @transform_7(%arg0: i32) -> (i32, i32) {
    %c0_i32 = arith.constant 0 : i32
    %c0_i32_0 = arith.constant 0 : i32
    %c0_i32_1 = arith.constant 0 : i32
    return %c0_i32, %c0_i32_0 : i32, i32
  }
  func.func @transform_8(%arg0: i32) -> (i32, i32) {
    %c0_i32 = arith.constant 0 : i32
    %c0_i32_0 = arith.constant 0 : i32
    %c0_i32_1 = arith.constant 0 : i32
    return %c0_i32, %c0_i32_0 : i32, i32
  }
  func.func @transform_9(%arg0: i32) -> (i32, i32) {
    %c0_i32 = arith.constant 0 : i32
    %c0_i32_0 = arith.constant 0 : i32
    %c0_i32_1 = arith.constant 0 : i32
    return %c0_i32, %c0_i32_0 : i32, i32
  }
  func.func @transform_10(%arg0: i32) -> (i32, i32) {
    %c0_i32 = arith.constant 0 : i32
    %c0_i32_0 = arith.constant 0 : i32
    %c0_i32_1 = arith.constant 0 : i32
    return %c0_i32, %c0_i32_0 : i32, i32
  }
  func.func @transform_11(%arg0: i32) -> (i32, i32, i32) {
    %c0_i32 = arith.constant 0 : i32
    %c0_i32_0 = arith.constant 0 : i32
    %c0_i32_1 = arith.constant 0 : i32
    return %arg0, %c0_i32, %c0_i32_0 : i32, i32, i32
  }
}

</mosaic_0001>

<bundles_post_ra>
// kernel: tpu_custom_call.1
= control target key start
LH: loop header
LB: loop body
LE: loop exit
PB: predicated region body
PF: predicated region fallthrough
CT: control target
= control target key end

     0   :  { %16 = vsyncpa [#allocation3], 0  ;;  %s1372_s0 = inlined_call_operand.hbm [shape: f32[4,8,128], index: 0, kind: input, shape index: {}]   ;;  %s1373_s1 = inlined_call_operand.hbm [shape: bf16[128,128], index: 1, kind: input, shape index: {}]   ;;  %s1374_s2 = inlined_call_operand.vmem [shape: f32[1,128], index: 2, kind: input, shape index: {}]   ;;  %s1375_s3 = inlined_call_operand.vmem [shape: f32[1,128], index: 3, kind: input, shape index: {}]   ;;  %s1376_s4 = inlined_call_operand.vmem [shape: f32[1,128], index: 4, kind: input, shape index: {}]   ;;  %s1377_s5 = inlined_call_operand.vmem [shape: f32[1,128], index: 5, kind: input, shape index: {}]   ;;  %s1378_s6 = inlined_call_operand.vmem [shape: f32[1,128], index: 6, kind: input, shape index: {}]   ;;  %s1379_s7 = inlined_call_operand.hbm [shape: bf16[128,128], index: 7, kind: input, shape index: {}]   ;;  %s1380_s8 = inlined_call_operand.vmem [shape: f32[1,128], index: 8, kind: input, shape index: {}]   ;;  %s1381_s9 = inlined_call_operand.hbm [shape: bf16[128,128], index: 9, kind: input, shape index: {}]   ;;  %s1382_s10 = inlined_call_operand.vmem [shape: f32[1,128], index: 10, kind: input, shape index: {}]   ;;  %s1383_s11 = inlined_call_operand.hbm [shape: f32[4,8,128], index: 11, kind: output, shape index: {}]  }
   0x1   :  { %17 = vsyncpa [#allocation6], 0 }
   0x2   :  { %18 = vsyncpa [#allocation9], 0 }
   0x3   :  { %19 = vsyncpa [#allocation4], 0  ;;  %s1116_s17 = smov [#allocation5]   ;;  %s998_s21 = scalar_lea.hbm %s1373_s1, 1024 }
   0x4   :  { %s37_s18 = sshll.u32 %s1116_s17, 4  ;;  %p999_p0 = scmp.ne.s32.totalorder %s1373_s1, %s998_s21  ;;  %s38_s18 = int_to_ptr.vmem [resolvable:$true] %s37_s18 }
   0x5   :  { %p1002_p1 = scmp.lt.u32.totalorder %s998_s21, %s1373_s1 }
   0x7   :  { %p1004_p2 = pnand %p1002_p1, %p999_p0 }
   0x9   :  { %1007 = shalt.err (!%p1004_p2)
}
   0xa   :  { %s1008_s26 = scalar_lea.vmem %s38_s18, 1024  ;;  %p1013_p4 = scmp.lt.s32.totalorder %s38_s18, %s38_s18 }
   0xb   :  { %p1009_p3 = scmp.ne.s32.totalorder %s38_s18, %s1008_s26  ;;  %p1014_p5 = scmp.lt.s32.totalorder %s1008_s26, %s1008_s26 }
   0xd   :  { %p1015_p6 = por %p1014_p5, %p1013_p4 }
   0xf   :  { %p1016_p7 = pnand %p1015_p6, %p1009_p3 }
  0x11   :  { %1019 = shalt.err (!%p1016_p7)
}
  0x12   :  { %s1117_s27 = smov 64   ;;  %s1118_s28 = smov 4  }
  0x13   :  { %43 = dma.hbm_to_vmem [thread:$0]  %s1373_s1, 1024, %s38_s18, [#allocation6], %s1117_s27, %s1117_s27, %s1118_s28  }
  0x14   :  { %s1119_s12 = smov [#allocation2]   ;;  %s1020_s16 = scalar_lea.hbm %s1372_s0, 512 }
  0x15   :  { %s25_s13 = sshll.u32 %s1119_s12, 4  ;;  %p1021_p8 = scmp.ne.s32.totalorder %s1372_s0, %s1020_s16  ;;  %s26_s13 = int_to_ptr.vmem [resolvable:$true] %s25_s13 }
  0x16   :  { %p1024_p9 = scmp.lt.u32.totalorder %s1020_s16, %s1372_s0 }
  0x18   :  { %p1026_p10 = pnand %p1024_p9, %p1021_p8 }
  0x1a   :  { %1029 = shalt.err (!%p1026_p10)
}
  0x1b   :  { %s1030_s22 = scalar_lea.vmem %s26_s13, 512  ;;  %p1035_p12 = scmp.lt.s32.totalorder %s26_s13, %s26_s13 }
  0x1c   :  { %p1031_p11 = scmp.ne.s32.totalorder %s26_s13, %s1030_s22  ;;  %p1036_p13 = scmp.lt.s32.totalorder %s1030_s22, %s1030_s22 }
  0x1e   :  { %p1037_p0 = por %p1036_p13, %p1035_p12 }
  0x20   :  { %p1038_p1 = pnand %p1037_p0, %p1031_p11 }
  0x22   :  { %1041 = shalt.err (!%p1038_p1)
}
  0x23   :  { %s1120_s1 = smov 128   ;;  %s1121_s18 = smov 8  }
  0x24   :  { %31 = dma.hbm_to_vmem [thread:$0]  %s1372_s0, 512, %s26_s13, [#allocation3], %s1120_s1, %s1120_s1, %s1121_s18  }
  0x25   :  { %s1122_s25 = smov [#allocation7]   ;;  %s1123_s29 = smov [#allocation8]  }
  0x26   :  { %s59_s26 = sshll.u32 %s1122_s25, 4  ;;  %s73_s30 = sshll.u32 %s1123_s29, 4  ;;  %s60_s26 = int_to_ptr.vmem [resolvable:$true] %s59_s26  ;;  %s1215_s30 = int_to_ptr.vmem [resolvable:$true] %s73_s30 }
  0x27   :  { %s1042_s15 = scalar_lea.hbm %s1379_s7, 1024 }
  0x28   :  { %p1043_p2 = scmp.ne.s32.totalorder %s1379_s7, %s1042_s15  ;;  %p1046_p3 = scmp.lt.u32.totalorder %s1042_s15, %s1379_s7 }
  0x2a   :  { %p1048_p4 = pnand %p1046_p3, %p1043_p2 }
  0x2c   :  { %1051 = shalt.err (!%p1048_p4)
}
  0x2d   :  { %s1052_s0 = scalar_lea.vmem %s60_s26, 1024  ;;  %p1057_p6 = scmp.lt.s32.totalorder %s60_s26, %s60_s26 }
  0x2e   :  { %p1053_p5 = scmp.ne.s32.totalorder %s60_s26, %s1052_s0  ;;  %p1058_p7 = scmp.lt.s32.totalorder %s1052_s0, %s1052_s0 }
  0x30   :  { %p1059_p8 = por %p1058_p7, %p1057_p6 }
  0x32   :  { %p1060_p9 = pnand %p1059_p8, %p1053_p5 }
  0x34   :  { %1063 = shalt.err (!%p1060_p9)
}
  0x35   :  { %65 = dma.hbm_to_vmem [thread:$0]  %s1379_s7, 1024, %s60_s26, [#allocation6], %s1117_s27, %s1117_s27, %s1118_s28  }
  0x36   :  { %s1064_s24 = scalar_lea.hbm %s1381_s9, 1024 }
  0x37   :  { %p1065_p10 = scmp.ne.s32.totalorder %s1381_s9, %s1064_s24  ;;  %p1068_p11 = scmp.lt.u32.totalorder %s1064_s24, %s1381_s9 }
  0x39   :  { %p1070_p12 = pnand %p1068_p11, %p1065_p10 }
  0x3b   :  { %1073 = shalt.err (!%p1070_p12)
}
  0x3c   :  { %s1074_s15 = scalar_lea.vmem %s1215_s30, 1024  ;;  %p1079_p0 = scmp.lt.s32.totalorder %s1215_s30, %s1215_s30 }
  0x3d   :  { %p1075_p13 = scmp.ne.s32.totalorder %s1215_s30, %s1074_s15  ;;  %p1080_p1 = scmp.lt.s32.totalorder %s1074_s15, %s1074_s15 }
  0x3f   :  { %p1081_p2 = por %p1080_p1, %p1079_p0 }
  0x41   :  { %p1082_p3 = pnand %p1081_p2, %p1075_p13 }
  0x43   :  { %1085 = shalt.err (!%p1082_p3)
}
  0x44   :  { %79 = dma.hbm_to_vmem [thread:$0]  %s1381_s9, 1024, %s1215_s30, [#allocation9], %s1117_s27, %s1117_s27, %s1118_s28  }
  0x45   :  { %1108 = dma.done.wait [#allocation3], 512  }
  0x46   :  { %1109 = vsyncadd [#allocation3], 4294966784 }
  0x47   :  { %1110 = dma.done.wait [#allocation6], 2048  }
  0x48   :  { %1111 = vsyncadd [#allocation6], 4294965248 }
  0x49   :  { %1112 = dma.done.wait [#allocation9], 1024  }
  0x4a   :  { %1113 = vsyncadd [#allocation9], 4294966272  ;;  %v1252_v0 = vld [vmem:[#allocation2 + $0x10] sm:$0xff]  ;;  %v1254_v1 = vld [vmem:[#allocation2] sm:$0xff] }
  0x4b   :  { %v1256_v2 = vld [vmem:[#allocation2 + $0x18] sm:$0xff]  ;;  %105 = vadd.xlane.f32.xlu1 %v1252_v0  ;;  %101 = vadd.xlane.f32.xlu0 %v1254_v1  ;;  %v1260_v3 = vld [vmem:[#allocation2 + $0x8] sm:$0xff]  ;;  %v109_v5 = vmul.f32 %v1254_v1, %v1254_v1  ;;  %v111_v7 = vmul.f32 %v1252_v0, %v1252_v0  ;;  %v926_v8 = vld [vmem:[#allocation5] sm:$0xff]  }
  0x4c   :  { %v110_v4 = vmul.f32 %v1260_v3, %v1260_v3  ;;  %v112_v6 = vmul.f32 %v1256_v2, %v1256_v2  ;;  %857 = vmatprep.subr.bf16.mxu0 %v926_v8  ;;  %v927_v9 = vld [vmem:[#allocation5 + $0x8] sm:$0xff]   ;;  %v928_v10 = vld [vmem:[#allocation5 + $0x10] sm:$0xff]   ;;  %v929_v11 = vld [vmem:[#allocation5 + $0x18] sm:$0xff]  }
  0x4d   :  { %858 = vmatpush3.bf16.msra.mxu0 %v926_v8  ;;  %v930_v12 = vld [vmem:[#allocation5 + $0x20] sm:$0xff]   ;;  %v931_v13 = vld [vmem:[#allocation5 + $0x28] sm:$0xff]   ;;  %v932_v14 = vld [vmem:[#allocation5 + $0x30] sm:$0xff]  }
  0x4e   :  { %859 = vmatprep.subr.bf16.mxu0 %v927_v9  ;;  %v933_v15 = vld [vmem:[#allocation5 + $0x38] sm:$0xff]   ;;  %v796_v51 = vld [vmem:[%s1375_s3] ss:$0 sm:$0xff] }
  0x4f   :  { %107 = vadd.xlane.f32.xlu1 %v1256_v2  ;;  %103 = vadd.xlane.f32.xlu0 %v1260_v3  ;;  %v797_v54 = vld [vmem:[%s1376_s4] ss:$0 sm:$0xff] }
  0x50   :  { %v798_v8 = vld [vmem:[%s1374_s2] ss:$0 sm:$0xff] }
  0x51   :  { %860 = vmatpush3.bf16.msra.mxu0 %v927_v9 }
  0x52   :  { %861 = vmatprep.subr.bf16.mxu0 %v928_v10 }
  0x53   :  { %115 = vadd.xlane.f32.xlu1 %v110_v4  ;;  %113 = vadd.xlane.f32.xlu0 %v109_v5 }
  0x55   :  { %862 = vmatpush3.bf16.msra.mxu0 %v928_v10 }
  0x56   :  { %863 = vmatprep.subr.bf16.mxu0 %v929_v11 }
  0x57   :  { %119 = vadd.xlane.f32.xlu1 %v112_v6  ;;  %117 = vadd.xlane.f32.xlu0 %v111_v7 }
  0x59   :  { %864 = vmatpush3.bf16.msra.mxu0 %v929_v11 }
  0x5a   :  { %865 = vmatprep.subr.bf16.mxu0 %v930_v12 }
  0x5d   :  { %866 = vmatpush3.bf16.msra.mxu0 %v930_v12 }
  0x5e   :  { %867 = vmatprep.subr.bf16.mxu0 %v931_v13 }
  0x61   :  { %868 = vmatpush3.bf16.msra.mxu0 %v931_v13 }
  0x62   :  { %869 = vmatprep.subr.bf16.mxu0 %v932_v14 }
  0x65   :  { %870 = vmatpush3.bf16.msra.mxu0 %v932_v14 }
  0x66   :  { %871 = vmatprep.subr.bf16.mxu0 %v933_v15 }
  0x69   :  { %872 = vmatpush3.bf16.msra.mxu0 %v933_v15 }
  0xd8   :  { %v106_v16 = vpop.xlane.xlu1 %105  ;;  %v102_v17 = vpop.xlane.xlu0 %101 }
  0xd9   :  { %v121_v20 = vmul.f32 0.03125, %v102_v17  ;;  %v123_v22 = vmul.f32 0.03125, %v106_v16 }
  0xdb   :  { %v129_v26 = vmul.f32 %v121_v20, %v121_v20  ;;  %v131_v32 = vmul.f32 %v123_v22, %v123_v22  ;;  %v141_v50 = vsub.f32 %v1254_v1, %v121_v20  ;;  %v143_v59 = vsub.f32 %v1252_v0, %v123_v22 }
  0xdc   :  { %v108_v18 = vpop.xlane.xlu1 %107  ;;  %v104_v19 = vpop.xlane.xlu0 %103 }
  0xdd   :  { %v122_v21 = vmul.f32 0.03125, %v104_v19  ;;  %v124_v23 = vmul.f32 0.03125, %v108_v18 }
  0xdf   :  { %v130_v27 = vmul.f32 %v122_v21, %v122_v21  ;;  %v132_v33 = vmul.f32 %v124_v23, %v124_v23  ;;  %v142_v48 = vsub.f32 %v1260_v3, %v122_v21  ;;  %v144_v56 = vsub.f32 %v1256_v2, %v124_v23 }
  0xe0   :  { %v116_v24 = vpop.xlane.xlu1 %115  ;;  %v114_v25 = vpop.xlane.xlu0 %113 }
  0xe1   :  { %v126_v28 = vmul.f32 0.03125, %v116_v24  ;;  %v125_v29 = vmul.f32 0.03125, %v114_v25 }
  0xe3   :  { %v134_v30 = vsub.f32 %v126_v28, %v130_v27  ;;  %v133_v31 = vsub.f32 %v125_v29, %v129_v26 }
  0xe4   :  { %v120_v34 = vpop.xlane.xlu1 %119  ;;  %v118_v35 = vpop.xlane.xlu0 %117 }
  0xe5   :  { %v138_v36 = vmax.f32 %v134_v30, 0.0  ;;  %v137_v37 = vmax.f32 %v133_v31, 0.0  ;;  %v128_v38 = vmul.f32 0.03125, %v120_v34  ;;  %v127_v39 = vmul.f32 0.03125, %v118_v35 }
  0xe7   :  { %v146_v40 = vadd.f32 1e-05, %v138_v36  ;;  %v145_v41 = vadd.f32 1e-05, %v137_v37  ;;  %v136_v42 = vsub.f32 %v128_v38, %v132_v33  ;;  %v135_v43 = vsub.f32 %v127_v39, %v131_v32 }
  0xe9   :  { %950 = vrsqrt.f32 %v146_v40  ;;  %v140_v44 = vmax.f32 %v136_v42, 0.0  ;;  %v139_v45 = vmax.f32 %v135_v43, 0.0 }
  0xea   :  { %952 = vrsqrt.f32 %v145_v41 }
  0xeb   :  { %v148_v46 = vadd.f32 1e-05, %v140_v44  ;;  %v147_v47 = vadd.f32 1e-05, %v139_v45 }
  0xed   :  { %954 = vrsqrt.f32 %v148_v46 }
  0xee   :  { %956 = vrsqrt.f32 %v147_v47 }
  0xf3   :  { %v951_v49 = vpop.eup %950 }
  0xf4   :  { %v953_v52 = vpop.eup %952  ;;  %v154_v53 = vmul.f32 %v951_v49, %v142_v48 }
  0xf5   :  { %v153_v55 = vmul.f32 %v953_v52, %v141_v50 }
  0xf6   :  { %v164_v57 = vmul.f32 %v796_v51, %v154_v53 }
  0xf7   :  { %v955_v58 = vpop.eup %954  ;;  %v163_v60 = vmul.f32 %v796_v51, %v153_v55 }
  0xf8   :  { %v957_v61 = vpop.eup %956  ;;  %v1282_v62 = vadd.f32 %v797_v54, %v164_v57  ;;  %v156_v63 = vmul.f32 %v955_v58, %v144_v56 }
  0xf9   :  { %v1284_v1 = vadd.f32 %v797_v54, %v163_v60  ;;  %v155_v3 = vmul.f32 %v957_v61, %v143_v59 }
  0xfa   :  { %v166_v4 = vmul.f32 %v796_v51, %v156_v63 }
  0xfb   :  { %v177_v5 = vpack.c.bf16 %v1282_v62, %v1284_v1  ;;  %v165_v6 = vmul.f32 %v796_v51, %v155_v3 }
  0xfc   :  { %v1288_v7 = vadd.f32 %v797_v54, %v166_v4 }
  0xfd   :  { %873 = vmatprep.mubr.bf16.mxu0 %v177_v5  ;;  %v1290_v2 = vadd.f32 %v797_v54, %v165_v6 }
  0xff   :  { %v178_v0 = vpack.c.bf16 %v1288_v7, %v1290_v2 }
 0x101   :  { %874 = vmatmul.mubr.bf16.vlgmr.msra.gmra.mrb[0].mxu0 %v178_v0 }
 0x1d4   :  { %v875_v9 = vpop.f32.mrb[0].mxu0 }
 0x1d5   :  { %v293_v10 = vadd.f32 %v875_v9, %v798_v8  ;;  %v284_v11 = vpop.f32.mrb[1].mxu0 }
 0x1d6   :  { %v285_v12 = vadd.f32 %v798_v8, %v284_v11  ;;  %v876_v13 = vpop.f32.mrb[2].mxu0 }
 0x1d7   :  { %v311_v14 = vrot.slane %v293_v10, 4  ;;  %v296_v15 = vadd.f32 %v876_v13, %v798_v8  ;;  %v287_v16 = vpop.f32.mrb[3].mxu0 }
 0x1d8   :  { %v299_v17 = vrot.slane %v285_v12, 4  ;;  %v288_v18 = vadd.f32 %v798_v8, %v287_v16 }
 0x1d9   :  { %v312_v19 = vmax.f32 %v293_v10, %v311_v14  ;;  %v317_v20 = vrot.slane %v296_v15, 4 }
 0x1da   :  { %v300_v21 = vmax.f32 %v285_v12, %v299_v17  ;;  %v305_v22 = vrot.slane %v288_v18, 4 }
 0x1db   :  { %v313_v23 = vrot.slane %v312_v19, 2  ;;  %v318_v24 = vmax.f32 %v296_v15, %v317_v20 }
 0x1dc   :  { %v301_v25 = vrot.slane %v300_v21, 2  ;;  %v306_v26 = vmax.f32 %v288_v18, %v305_v22 }
 0x1dd   :  { %v314_v27 = vmax.f32 %v312_v19, %v313_v23  ;;  %v319_v28 = vrot.slane %v318_v24, 2 }
 0x1de   :  { %v302_v29 = vmax.f32 %v300_v21, %v301_v25  ;;  %v307_v30 = vrot.slane %v306_v26, 2 }
 0x1df   :  { %v315_v31 = vrot.slane %v314_v27, 1  ;;  %v320_v32 = vmax.f32 %v318_v24, %v319_v28 }
 0x1e0   :  { %v303_v33 = vrot.slane %v302_v29, 1  ;;  %v308_v34 = vmax.f32 %v306_v26, %v307_v30 }
 0x1e1   :  { %v316_v35 = vmax.f32 %v314_v27, %v315_v31  ;;  %v321_v36 = vrot.slane %v320_v32, 1 }
 0x1e2   :  { %v304_v37 = vmax.f32 %v302_v29, %v303_v33  ;;  %v309_v38 = vrot.slane %v308_v34, 1 }
 0x1e3   :  { %v325_v39 = vsub.f32 %v293_v10, %v316_v35  ;;  %v322_v40 = vmax.f32 %v320_v32, %v321_v36  ;;  %v936_v35 = vld [vmem:[#allocation7 + $0x10] sm:$0xff]   ;;  %v937_v36 = vld [vmem:[#allocation7 + $0x18] sm:$0xff]  }
 0x1e4   :  { %v323_v41 = vsub.f32 %v285_v12, %v304_v37  ;;  %v310_v42 = vmax.f32 %v308_v34, %v309_v38  ;;  %v935_v34 = vld [vmem:[#allocation7 + $0x8] sm:$0xff]   ;;  %v938_v37 = vld [vmem:[#allocation7 + $0x20] sm:$0xff]  }
 0x1e5   :  { %v331_v43 = vmul.f32 1.442695, %v325_v39  ;;  %v326_v44 = vsub.f32 %v296_v15, %v322_v40  ;;  %v939_v38 = vld [vmem:[#allocation7 + $0x28] sm:$0xff]   ;;  %v940_v39 = vld [vmem:[#allocation7 + $0x30] sm:$0xff]   ;;  %v941_v40 = vld [vmem:[#allocation7 + $0x38] sm:$0xff]  }
 0x1e6   :  { %v327_v45 = vmul.f32 1.442695, %v323_v41  ;;  %v324_v46 = vsub.f32 %v288_v18, %v310_v42 }
 0x1e7   :  { %958 = vpow2.f32 %v331_v43  ;;  %v333_v47 = vmul.f32 1.442695, %v326_v44 }
 0x1e8   :  { %960 = vpow2.f32 %v327_v45  ;;  %v329_v48 = vmul.f32 1.442695, %v324_v46 }
 0x1e9   :  { %962 = vpow2.f32 %v333_v47 }
 0x1ea   :  { %964 = vpow2.f32 %v329_v48 }
 0x1f1   :  { %v959_v49 = vpop.eup %958 }
 0x1f2   :  { %v961_v50 = vpop.eup %960  ;;  %v347_v51 = vrot.slane %v959_v49, 4 }
 0x1f3   :  { %v963_v52 = vpop.eup %962  ;;  %v335_v53 = vrot.slane %v961_v50, 4 }
 0x1f4   :  { %v965_v54 = vpop.eup %964  ;;  %v348_v55 = vadd.f32 %v959_v49, %v347_v51  ;;  %v353_v56 = vrot.slane %v963_v52, 4 }
 0x1f5   :  { %v336_v57 = vadd.f32 %v961_v50, %v335_v53  ;;  %v341_v58 = vrot.slane %v965_v54, 4 }
 0x1f6   :  { %v349_v59 = vrot.slane %v348_v55, 2  ;;  %v354_v60 = vadd.f32 %v963_v52, %v353_v56 }
 0x1f7   :  { %v337_v61 = vrot.slane %v336_v57, 2  ;;  %v342_v63 = vadd.f32 %v965_v54, %v341_v58 }
 0x1f8   :  { %v350_v3 = vadd.f32 %v349_v59, %v348_v55  ;;  %v355_v4 = vrot.slane %v354_v60, 2 }
 0x1f9   :  { %v338_v5 = vadd.f32 %v337_v61, %v336_v57  ;;  %v343_v6 = vrot.slane %v342_v63, 2 }
 0x1fa   :  { %v351_v0 = vrot.slane %v350_v3, 1  ;;  %v356_v8 = vadd.f32 %v355_v4, %v354_v60 }
 0x1fb   :  { %v339_v9 = vrot.slane %v338_v5, 1  ;;  %v344_v10 = vadd.f32 %v343_v6, %v342_v63 }
 0x1fc   :  { %v352_v11 = vadd.f32 %v351_v0, %v350_v3  ;;  %v357_v12 = vrot.slane %v356_v8, 1 }
 0x1fd   :  { %v340_v13 = vadd.f32 %v339_v9, %v338_v5  ;;  %v345_v14 = vrot.slane %v344_v10, 1 }
 0x1fe   :  { %966 = vrcp.f32 %v352_v11  ;;  %v358_v15 = vadd.f32 %v357_v12, %v356_v8 }
 0x1ff   :  { %968 = vrcp.f32 %v340_v13  ;;  %v346_v16 = vadd.f32 %v345_v14, %v344_v10 }
 0x200   :  { %970 = vrcp.f32 %v358_v15  ;;  %v807_v15 = vld [vmem:[%s1377_s5] ss:$0 sm:$0xff] }
 0x201   :  { %972 = vrcp.f32 %v346_v16 }
 0x208   :  { %v967_v17 = vpop.eup %966 }
 0x209   :  { %v969_v18 = vpop.eup %968  ;;  %v365_v19 = vmul.f32 %v967_v17, %v959_v49 }
 0x20a   :  { %v971_v20 = vpop.eup %970  ;;  %v363_v21 = vmul.f32 %v969_v18, %v961_v50 }
 0x20b   :  { %v973_v22 = vpop.eup %972  ;;  %v369_v23 = vmul.f32 %v365_v19, %v1290_v2  ;;  %v366_v24 = vmul.f32 %v971_v20, %v963_v52 }
 0x20c   :  { %v364_v25 = vmul.f32 %v973_v22, %v965_v54  ;;  %v367_v28 = vmul.f32 %v363_v21, %v1284_v1 }
 0x20d   :  { %v1299_v26 = vadd.f32 %v369_v23, %v1290_v2  ;;  %v370_v27 = vmul.f32 %v366_v24, %v1288_v7  ;;  %v808_v23 = vld [vmem:[%s1378_s6] ss:$0 sm:$0xff] }
 0x20e   :  { %v368_v30 = vmul.f32 %v364_v25, %v1282_v62  ;;  %v1310_v31 = vadd.f32 %v367_v28, %v1284_v1 }
 0x20f   :  { %381 = vadd.xlane.f32.xlu0 %v1299_v26  ;;  %v1305_v29 = vadd.f32 %v370_v27, %v1288_v7  ;;  %v387_v33 = vmul.f32 %v1299_v26, %v1299_v26 }
 0x210   :  { %v1314_v2 = vadd.f32 %v368_v30, %v1282_v62  ;;  %v385_v32 = vmul.f32 %v1310_v31, %v1310_v31  ;;  %v934_v62 = vld [vmem:[#allocation7] sm:$0xff]  }
 0x211   :  { %383 = vadd.xlane.f32.xlu1 %v1305_v29  ;;  %v388_v1 = vmul.f32 %v1305_v29, %v1305_v29  ;;  %877 = vmatprep.subr.bf16.mxu1 %v934_v62 }
 0x212   :  { %v386_v7 = vmul.f32 %v1314_v2, %v1314_v2  ;;  %878 = vmatpush3.bf16.msra.mxu1 %v934_v62  ;;  %v942_v62 = vld [vmem:[#allocation8] sm:$0xff]  }
 0x213   :  { %377 = vadd.xlane.f32.xlu0 %v1310_v31  ;;  %879 = vmatprep.subr.bf16.mxu1 %v935_v34 }
 0x214   :  { %897 = vmatprep.subr.bf16.mxu0 %v942_v62 }
 0x215   :  { %379 = vadd.xlane.f32.xlu1 %v1314_v2  ;;  %898 = vmatpush3.bf16.msra.mxu0 %v942_v62 }
 0x216   :  { %880 = vmatpush3.bf16.msra.mxu1 %v935_v34  ;;  %v943_v34 = vld [vmem:[#allocation8 + $0x8] sm:$0xff]  }
 0x217   :  { %389 = vadd.xlane.f32.xlu0 %v385_v32  ;;  %881 = vmatprep.subr.bf16.mxu1 %v936_v35 }
 0x218   :  { %899 = vmatprep.subr.bf16.mxu0 %v943_v34 }
 0x219   :  { %391 = vadd.xlane.f32.xlu1 %v386_v7  ;;  %900 = vmatpush3.bf16.msra.mxu0 %v943_v34 }
 0x21a   :  { %882 = vmatpush3.bf16.msra.mxu1 %v936_v35  ;;  %v944_v35 = vld [vmem:[#allocation8 + $0x10] sm:$0xff]  }
 0x21b   :  { %393 = vadd.xlane.f32.xlu0 %v387_v33  ;;  %883 = vmatprep.subr.bf16.mxu1 %v937_v36 }
 0x21c   :  { %901 = vmatprep.subr.bf16.mxu0 %v944_v35 }
 0x21d   :  { %395 = vadd.xlane.f32.xlu1 %v388_v1  ;;  %902 = vmatpush3.bf16.msra.mxu0 %v944_v35 }
 0x21e   :  { %884 = vmatpush3.bf16.msra.mxu1 %v937_v36  ;;  %v945_v36 = vld [vmem:[#allocation8 + $0x18] sm:$0xff]  }
 0x21f   :  { %885 = vmatprep.subr.bf16.mxu1 %v938_v37  ;;  %903 = vmatprep.subr.bf16.mxu0 %v945_v36 }
 0x221   :  { %904 = vmatpush3.bf16.msra.mxu0 %v945_v36 }
 0x222   :  { %886 = vmatpush3.bf16.msra.mxu1 %v938_v37  ;;  %v946_v37 = vld [vmem:[#allocation8 + $0x20] sm:$0xff]  }
 0x223   :  { %887 = vmatprep.subr.bf16.mxu1 %v939_v38  ;;  %905 = vmatprep.subr.bf16.mxu0 %v946_v37 }
 0x225   :  { %906 = vmatpush3.bf16.msra.mxu0 %v946_v37 }
 0x226   :  { %888 = vmatpush3.bf16.msra.mxu1 %v939_v38  ;;  %v947_v38 = vld [vmem:[#allocation8 + $0x28] sm:$0xff]  }
 0x227   :  { %889 = vmatprep.subr.bf16.mxu1 %v940_v39  ;;  %907 = vmatprep.subr.bf16.mxu0 %v947_v38 }
 0x229   :  { %908 = vmatpush3.bf16.msra.mxu0 %v947_v38 }
 0x22a   :  { %890 = vmatpush3.bf16.msra.mxu1 %v940_v39  ;;  %v948_v39 = vld [vmem:[#allocation8 + $0x30] sm:$0xff]  }
 0x22b   :  { %891 = vmatprep.subr.bf16.mxu1 %v941_v40  ;;  %909 = vmatprep.subr.bf16.mxu0 %v948_v39 }
 0x22d   :  { %910 = vmatpush3.bf16.msra.mxu0 %v948_v39 }
 0x22e   :  { %892 = vmatpush3.bf16.msra.mxu1 %v941_v40  ;;  %v949_v40 = vld [vmem:[#allocation8 + $0x38] sm:$0xff]  }
 0x22f   :  { %911 = vmatprep.subr.bf16.mxu0 %v949_v40 }
 0x231   :  { %912 = vmatpush3.bf16.msra.mxu0 %v949_v40 }
 0x29c   :  { %v382_v41 = vpop.xlane.xlu0 %381 }
 0x29d   :  { %v399_v48 = vmul.f32 0.03125, %v382_v41  ;;  %v809_v41 = vld [vmem:[%s1380_s8] ss:$0 sm:$0xff] }
 0x29e   :  { %v384_v42 = vpop.xlane.xlu1 %383 }
 0x29f   :  { %v400_v51 = vmul.f32 0.03125, %v384_v42  ;;  %v407_v57 = vmul.f32 %v399_v48, %v399_v48  ;;  %v419_v19 = vsub.f32 %v1299_v26, %v399_v48 }
 0x2a0   :  { %v378_v43 = vpop.xlane.xlu0 %377 }
 0x2a1   :  { %v397_v44 = vmul.f32 0.03125, %v378_v43  ;;  %v408_v61 = vmul.f32 %v400_v51, %v400_v51  ;;  %v420_v24 = vsub.f32 %v1305_v29, %v400_v51 }
 0x2a2   :  { %v380_v45 = vpop.xlane.xlu1 %379 }
 0x2a3   :  { %v398_v46 = vmul.f32 0.03125, %v380_v45  ;;  %v405_v49 = vmul.f32 %v397_v44, %v397_v44  ;;  %v417_v13 = vsub.f32 %v1310_v31, %v397_v44 }
 0x2a4   :  { %v390_v47 = vpop.xlane.xlu0 %389 }
 0x2a5   :  { %v401_v50 = vmul.f32 0.03125, %v390_v47  ;;  %v406_v53 = vmul.f32 %v398_v46, %v398_v46  ;;  %v418_v16 = vsub.f32 %v1314_v2, %v398_v46 }
 0x2a6   :  { %v392_v52 = vpop.xlane.xlu1 %391 }
 0x2a7   :  { %v409_v54 = vsub.f32 %v401_v50, %v405_v49  ;;  %v402_v55 = vmul.f32 0.03125, %v392_v52 }
 0x2a8   :  { %v394_v56 = vpop.xlane.xlu0 %393 }
 0x2a9   :  { %v413_v58 = vmax.f32 %v409_v54, 0.0  ;;  %v410_v59 = vsub.f32 %v402_v55, %v406_v53  ;;  %v403_v60 = vmul.f32 0.03125, %v394_v56 }
 0x2aa   :  { %v396_v63 = vpop.xlane.xlu1 %395 }
 0x2ab   :  { %v421_v3 = vadd.f32 1e-05, %v413_v58  ;;  %v414_v4 = vmax.f32 %v410_v59, 0.0  ;;  %v411_v5 = vsub.f32 %v403_v60, %v407_v57  ;;  %v404_v6 = vmul.f32 0.03125, %v396_v63 }
 0x2ad   :  { %974 = vrsqrt.f32 %v421_v3  ;;  %v422_v0 = vadd.f32 1e-05, %v414_v4  ;;  %v415_v8 = vmax.f32 %v411_v5, 0.0  ;;  %v412_v9 = vsub.f32 %v404_v6, %v408_v61 }
 0x2af   :  { %976 = vrsqrt.f32 %v422_v0  ;;  %v423_v10 = vadd.f32 1e-05, %v415_v8  ;;  %v416_v11 = vmax.f32 %v412_v9, 0.0 }
 0x2b1   :  { %978 = vrsqrt.f32 %v423_v10  ;;  %v424_v12 = vadd.f32 1e-05, %v416_v11 }
 0x2b3   :  { %980 = vrsqrt.f32 %v424_v12 }
 0x2b7   :  { %v975_v14 = vpop.eup %974 }
 0x2b8   :  { %v429_v17 = vmul.f32 %v975_v14, %v417_v13 }
 0x2b9   :  { %v977_v18 = vpop.eup %976 }
 0x2ba   :  { %v430_v20 = vmul.f32 %v977_v18, %v418_v16  ;;  %v439_v21 = vmul.f32 %v807_v15, %v429_v17 }
 0x2bb   :  { %v979_v22 = vpop.eup %978 }
 0x2bc   :  { %v440_v25 = vmul.f32 %v807_v15, %v430_v20  ;;  %v431_v27 = vmul.f32 %v979_v22, %v419_v19  ;;  %v1335_v30 = vadd.f32 %v808_v23, %v439_v21 }
 0x2bd   :  { %v981_v28 = vpop.eup %980 }
 0x2be   :  { %v1337_v31 = vadd.f32 %v808_v23, %v440_v25  ;;  %v432_v2 = vmul.f32 %v981_v28, %v420_v24  ;;  %v441_v32 = vmul.f32 %v807_v15, %v431_v27 }
 0x2c0   :  { %v453_v26 = vpack.c.bf16 %v1337_v31, %v1335_v30  ;;  %v442_v7 = vmul.f32 %v807_v15, %v432_v2  ;;  %v1341_v33 = vadd.f32 %v808_v23, %v441_v32  ;;  %v818_v2 = vld [vmem:[%s1382_s10] ss:$0 sm:$0xff]  ;;  %s1124_s10 = smov [#allocation10]  }
 0x2c1   :  { %s782_s0 = sshll.u32 %s1124_s10, 4  ;;  %s783_s0 = int_to_ptr.vmem [resolvable:$true] %s782_s0 }
 0x2c2   :  { %893 = vmatprep.mubr.bf16.mxu1 %v453_v26  ;;  %v1343_v1 = vadd.f32 %v808_v23, %v442_v7  ;;  %s1086_s13 = scalar_lea.vmem %s783_s0, 512  ;;  %p1091_p5 = scmp.lt.s32.totalorder %s783_s0, %s783_s0 }
 0x2c3   :  { %p1087_p4 = scmp.ne.s32.totalorder %s783_s0, %s1086_s13  ;;  %p1092_p6 = scmp.lt.s32.totalorder %s1086_s13, %s1086_s13 }
 0x2c4   :  { %v454_v29 = vpack.c.bf16 %v1343_v1, %v1341_v33 }
 0x2c5   :  { %p1093_p7 = por %p1092_p6, %p1091_p5 }
 0x2c6   :  { %894 = vmatmul.mubr.bf16.vlgmr.msra.gmra.mrb[0].mxu1 %v454_v29 }
 0x2c7   :  { %p1094_p8 = pnand %p1093_p7, %p1087_p4 }
 0x399   :  { %v895_v42 = vpop.f32.mrb[0].mxu1 }
 0x39a   :  { %v569_v43 = vadd.f32 %v895_v42, %v809_v41  ;;  %v560_v44 = vpop.f32.mrb[1].mxu1 }
 0x39b   :  { %v561_v45 = vadd.f32 %v809_v41, %v560_v44  ;;  %v896_v46 = vpop.f32.mrb[2].mxu1 }
 0x39c   :  { %v581_v47 = vmul.f32 0.044715, %v569_v43  ;;  %v572_v48 = vadd.f32 %v896_v46, %v809_v41  ;;  %v563_v49 = vpop.f32.mrb[3].mxu1  ;;  %v577_v16 = vmul.f32 0.5, %v569_v43 }
 0x39d   :  { %v579_v50 = vmul.f32 0.044715, %v561_v45  ;;  %v564_v51 = vadd.f32 %v809_v41, %v563_v49  ;;  %v575_v19 = vmul.f32 0.5, %v561_v45 }
 0x39e   :  { %v585_v52 = vmul.f32 %v581_v47, %v569_v43  ;;  %v582_v53 = vmul.f32 0.044715, %v572_v48  ;;  %v578_v17 = vmul.f32 0.5, %v572_v48 }
 0x39f   :  { %v583_v54 = vmul.f32 %v579_v50, %v561_v45  ;;  %v580_v55 = vmul.f32 0.044715, %v564_v51  ;;  %v576_v20 = vmul.f32 0.5, %v564_v51 }
 0x3a0   :  { %v589_v56 = vmul.f32 %v585_v52, %v569_v43  ;;  %v586_v57 = vmul.f32 %v582_v53, %v572_v48 }
 0x3a1   :  { %v587_v58 = vmul.f32 %v583_v54, %v561_v45  ;;  %v584_v59 = vmul.f32 %v580_v55, %v564_v51 }
 0x3a2   :  { %v593_v60 = vadd.f32 %v589_v56, %v569_v43  ;;  %v590_v61 = vmul.f32 %v586_v57, %v572_v48 }
 0x3a3   :  { %v588_v63 = vmul.f32 %v584_v59, %v564_v51  ;;  %v591_v3 = vadd.f32 %v587_v58, %v561_v45 }
 0x3a4   :  { %v597_v4 = vmul.f32 0.7978846, %v593_v60  ;;  %v594_v5 = vadd.f32 %v590_v61, %v572_v48 }
 0x3a5   :  { %v592_v6 = vadd.f32 %v588_v63, %v564_v51  ;;  %v595_v0 = vmul.f32 0.7978846, %v591_v3 }
 0x3a6   :  { %982 = vtanh.f32 %v597_v4  ;;  %v598_v8 = vmul.f32 0.7978846, %v594_v5 }
 0x3a7   :  { %v596_v9 = vmul.f32 0.7978846, %v592_v6  ;;  %984 = vtanh.f32 %v595_v0 }
 0x3a8   :  { %986 = vtanh.f32 %v598_v8 }
 0x3a9   :  { %988 = vtanh.f32 %v596_v9 }
 0x3b0   :  { %v983_v10 = vpop.eup %982 }
 0x3b1   :  { %v985_v11 = vpop.eup %984  ;;  %v605_v12 = vadd.f32 1.0, %v983_v10 }
 0x3b2   :  { %v987_v13 = vpop.eup %986  ;;  %v603_v14 = vadd.f32 1.0, %v985_v11 }
 0x3b3   :  { %v989_v15 = vpop.eup %988  ;;  %v606_v18 = vadd.f32 1.0, %v987_v13  ;;  %v609_v22 = vmul.f32 %v605_v12, %v577_v16 }
 0x3b4   :  { %v604_v21 = vadd.f32 1.0, %v989_v15  ;;  %v607_v24 = vmul.f32 %v603_v14, %v575_v19 }
 0x3b5   :  { %v610_v23 = vmul.f32 %v606_v18, %v578_v17 }
 0x3b6   :  { %v608_v25 = vmul.f32 %v604_v21, %v576_v20 }
 0x3b7   :  { %v612_v27 = vpack.c.bf16 %v610_v23, %v609_v22 }
 0x3b8   :  { %v611_v28 = vpack.c.bf16 %v608_v25, %v607_v24 }
 0x3ba   :  { %913 = vmatprep.mubr.bf16.mxu0 %v611_v28 }
 0x3bb   :  { %914 = vmatmul.mubr.bf16.vlgmr.msra.gmra.mrb[4].mxu0 %v612_v27 }
 0x48e   :  { %v915_v32 = vpop.f32.mrb[4].mxu0 }
 0x48f   :  { %v727_v26 = vadd.f32 %v915_v32, %v818_v2  ;;  %v718_v7 = vpop.f32.mrb[5].mxu0 }
 0x490   :  { %v719_v29 = vadd.f32 %v818_v2, %v718_v7  ;;  %v916_v62 = vpop.f32.mrb[6].mxu0 }
 0x491   :  { %v735_v34 = vadd.f32 %v727_v26, %v1341_v33  ;;  %v730_v35 = vadd.f32 %v916_v62, %v818_v2  ;;  %v721_v36 = vpop.f32.mrb[7].mxu0 }
 0x492   :  { %v733_v37 = vadd.f32 %v719_v29, %v1335_v30  ;;  %v722_v38 = vadd.f32 %v818_v2, %v721_v36 }
 0x493   :  { %v743_v39 = vmul.f32 0.044715, %v735_v34  ;;  %v736_v40 = vadd.f32 %v730_v35, %v1343_v1  ;;  %v739_v59 = vmul.f32 0.5, %v735_v34 }
 0x494   :  { %v741_v41 = vmul.f32 0.044715, %v733_v37  ;;  %v734_v42 = vadd.f32 %v722_v38, %v1337_v31  ;;  %v737_v63 = vmul.f32 0.5, %v733_v37 }
 0x495   :  { %v747_v43 = vmul.f32 %v743_v39, %v735_v34  ;;  %v744_v44 = vmul.f32 0.044715, %v736_v40  ;;  %v740_v5 = vmul.f32 0.5, %v736_v40 }
 0x496   :  { %v745_v45 = vmul.f32 %v741_v41, %v733_v37  ;;  %v742_v46 = vmul.f32 0.044715, %v734_v42  ;;  %v738_v8 = vmul.f32 0.5, %v734_v42 }
 0x497   :  { %v751_v47 = vmul.f32 %v747_v43, %v735_v34  ;;  %v748_v48 = vmul.f32 %v744_v44, %v736_v40 }
 0x498   :  { %v749_v49 = vmul.f32 %v745_v45, %v733_v37  ;;  %v746_v50 = vmul.f32 %v742_v46, %v734_v42 }
 0x499   :  { %v755_v33 = vadd.f32 %v751_v47, %v735_v34  ;;  %v752_v51 = vmul.f32 %v748_v48, %v736_v40 }
 0x49a   :  { %v753_v52 = vadd.f32 %v749_v49, %v733_v37  ;;  %v750_v53 = vmul.f32 %v746_v50, %v734_v42 }
 0x49b   :  { %v759_v30 = vmul.f32 0.7978846, %v755_v33  ;;  %v756_v54 = vadd.f32 %v752_v51, %v736_v40 }
 0x49c   :  { %v757_v55 = vmul.f32 0.7978846, %v753_v52  ;;  %v754_v56 = vadd.f32 %v750_v53, %v734_v42 }
 0x49d   :  { %v760_v1 = vmul.f32 0.7978846, %v756_v54  ;;  %990 = vtanh.f32 %v759_v30 }
 0x49e   :  { %v758_v57 = vmul.f32 0.7978846, %v754_v56  ;;  %992 = vtanh.f32 %v757_v55 }
 0x49f   :  { %994 = vtanh.f32 %v760_v1 }
 0x4a0   :  { %996 = vtanh.f32 %v758_v57 }
 0x4a7   :  { %v991_v31 = vpop.eup %990 }
 0x4a8   :  { %v993_v58 = vpop.eup %992  ;;  %v767_v60 = vadd.f32 1.0, %v991_v31 }
 0x4a9   :  { %v995_v61 = vpop.eup %994  ;;  %v765_v3 = vadd.f32 1.0, %v993_v58 }
 0x4aa   :  { %v997_v4 = vpop.eup %996  ;;  %v768_v6 = vadd.f32 1.0, %v995_v61  ;;  %v771_v0 = vmul.f32 %v767_v60, %v739_v59 }
 0x4ab   :  { %v766_v9 = vadd.f32 1.0, %v997_v4  ;;  %v769_v10 = vmul.f32 %v765_v3, %v737_v63 }
 0x4ac   :  { %v772_v11 = vmul.f32 %v768_v6, %v740_v5  ;;  %775 = vst [vmem:[#allocation10 + $0x10] sm:$0xff] %v771_v0 }
 0x4ad   :  { %v770_v12 = vmul.f32 %v766_v9, %v738_v8  ;;  %773 = vst [vmem:[#allocation10] sm:$0xff] %v769_v10 }
 0x4ae   :  { %776 = vst [vmem:[#allocation10 + $0x18] sm:$0xff] %v772_v11 }
 0x4af   :  { %774 = vst [vmem:[#allocation10 + $0x8] sm:$0xff] %v770_v12 }
 0x4b0   :  { %1097 = shalt.err (!%p1094_p8)
}
 0x4b1   :  { %s1098_s23 = scalar_lea.hbm %s1383_s11, 512 }
 0x4b2   :  { %p1099_p9 = scmp.ne.s32.totalorder %s1383_s11, %s1098_s23  ;;  %p1102_p10 = scmp.lt.u32.totalorder %s1098_s23, %s1383_s11 }
 0x4b4   :  { %p1104_p11 = pnand %p1102_p10, %p1099_p9 }
 0x4b6   :  { %1107 = shalt.err (!%p1104_p11)
}
 0x4b7   :  { %788 = dma.vmem_to_hbm [thread:$0]  %s783_s0, 512, %s1383_s11, [#allocation4], %s1120_s1, %s1120_s1, %s1121_s18  }
 0x4b8   :  { %1114 = dma.done.wait [#allocation4], 512  }
 0x4b9   :  { %1115 = vsyncadd [#allocation4], 4294966784 }
 0x4ba   :  { %792 = vsyncpa [#allocation3], 1 }
 0x4bb   :  { %793 = vsyncpa [#allocation6], 1 }
 0x4bc   :  { %794 = vsyncpa [#allocation9], 1 }
 0x4bd   :  { %795 = vsyncpa [#allocation4], 1 }

// kernel: tpu_custom_call.1
= control target key start
LH: loop header
LB: loop body
LE: loop exit
PB: predicated region body
PF: predicated region fallthrough
CT: control target
= control target key end

     0   :  { %16 = vsyncpa [#allocation3], 0  ;;  %s1372_s0 = inlined_call_operand.hbm [shape: f32[4,8,128], index: 0, kind: input, shape index: {}]   ;;  %s1373_s1 = inlined_call_operand.hbm [shape: bf16[128,128], index: 1, kind: input, shape index: {}]   ;;  %s1374_s2 = inlined_call_operand.vmem [shape: f32[1,128], index: 2, kind: input, shape index: {}]   ;;  %s1375_s3 = inlined_call_operand.vmem [shape: f32[1,128], index: 3, kind: input, shape index: {}]   ;;  %s1376_s4 = inlined_call_operand.vmem [shape: f32[1,128], index: 4, kind: input, shape index: {}]   ;;  %s1377_s5 = inlined_call_operand.vmem [shape: f32[1,128], index: 5, kind: input, shape index: {}]   ;;  %s1378_s6 = inlined_call_operand.vmem [shape: f32[1,128], index: 6, kind: input, shape index: {}]   ;;  %s1379_s7 = inlined_call_operand.hbm [shape: bf16[128,128], index: 7, kind: input, shape index: {}]   ;;  %s1380_s8 = inlined_call_operand.vmem [shape: f32[1,128], index: 8, kind: input, shape index: {}]   ;;  %s1381_s9 = inlined_call_operand.hbm [shape: bf16[128,128], index: 9, kind: input, shape index: {}]   ;;  %s1382_s10 = inlined_call_operand.vmem [shape: f32[1,128], index: 10, kind: input, shape index: {}]   ;;  %s1383_s11 = inlined_call_operand.hbm [shape: f32[4,8,128], index: 11, kind: output, shape index: {}]  }
   0x1   :  { %17 = vsyncpa [#allocation6], 0 }
   0x2   :  { %18 = vsyncpa [#allocation9], 0 }
   0x3   :  { %19 = vsyncpa [#allocation4], 0  ;;  %s1116_s17 = smov [#allocation5]   ;;  %s998_s21 = scalar_lea.hbm %s1373_s1, 1024 }
   0x4   :  { %s37_s18 = sshll.u32 %s1116_s17, 4  ;;  %p999_p0 = scmp.ne.s32.totalorder %s1373_s1, %s998_s21  ;;  %s38_s18 = int_to_ptr.vmem [resolvable:$true] %s37_s18 }
   0x5   :  { %p1002_p1 = scmp.lt.u32.totalorder %s998_s21, %s1373_s1 }
   0x7   :  { %p1004_p2 = pnand %p1002_p1, %p999_p0 }
   0x9   :  { %1007 = shalt.err (!%p1004_p2)
}
   0xa   :  { %s1008_s26 = scalar_lea.vmem %s38_s18, 1024  ;;  %p1013_p4 = scmp.lt.s32.totalorder %s38_s18, %s38_s18 }
   0xb   :  { %p1009_p3 = scmp.ne.s32.totalorder %s38_s18, %s1008_s26  ;;  %p1014_p5 = scmp.lt.s32.totalorder %s1008_s26, %s1008_s26 }
   0xd   :  { %p1015_p6 = por %p1014_p5, %p1013_p4 }
   0xf   :  { %p1016_p7 = pnand %p1015_p6, %p1009_p3 }
  0x11   :  { %1019 = shalt.err (!%p1016_p7)
}
  0x12   :  { %s1117_s27 = smov 64   ;;  %s1118_s28 = smov 4  }
  0x13   :  { %43 = dma.hbm_to_vmem [thread:$0]  %s1373_s1, 1024, %s38_s18, [#allocation6], %s1117_s27, %s1117_s27, %s1118_s28  }
  0x14   :  { %s1119_s12 = smov [#allocation2]   ;;  %s1020_s16 = scalar_lea.hbm %s1372_s0, 512 }
  0x15   :  { %s25_s13 = sshll.u32 %s1119_s12, 4  ;;  %p1021_p8 = scmp.ne.s32.totalorder %s1372_s0, %s1020_s16  ;;  %s26_s13 = int_to_ptr.vmem [resolvable:$true] %s25_s13 }
  0x16   :  { %p1024_p9 = scmp.lt.u32.totalorder %s1020_s16, %s1372_s0 }
  0x18   :  { %p1026_p10 = pnand %p1024_p9, %p1021_p8 }
  0x1a   :  { %1029 = shalt.err (!%p1026_p10)
}
  0x1b   :  { %s1030_s22 = scalar_lea.vmem %s26_s13, 512  ;;  %p1035_p12 = scmp.lt.s32.totalorder %s26_s13, %s26_s13 }
  0x1c   :  { %p1031_p11 = scmp.ne.s32.totalorder %s26_s13, %s1030_s22  ;;  %p1036_p13 = scmp.lt.s32.totalorder %s1030_s22, %s1030_s22 }
  0x1e   :  { %p1037_p0 = por %p1036_p13, %p1035_p12 }
  0x20   :  { %p1038_p1 = pnand %p1037_p0, %p1031_p11 }
  0x22   :  { %1041 = shalt.err (!%p1038_p1)
}
  0x23   :  { %s1120_s1 = smov 128   ;;  %s1121_s18 = smov 8  }
  0x24   :  { %31 = dma.hbm_to_vmem [thread:$0]  %s1372_s0, 512, %s26_s13, [#allocation3], %s1120_s1, %s1120_s1, %s1121_s18  }
  0x25   :  { %s1122_s25 = smov [#allocation7]   ;;  %s1123_s29 = smov [#allocation8]  }
  0x26   :  { %s59_s26 = sshll.u32 %s1122_s25, 4  ;;  %s73_s30 = sshll.u32 %s1123_s29, 4  ;;  %s60_s26 = int_to_ptr.vmem [resolvable:$true] %s59_s26  ;;  %s1215_s30 = int_to_ptr.vmem [resolvable:$true] %s73_s30 }
  0x27   :  { %s1042_s15 = scalar_lea.hbm %s1379_s7, 1024 }
  0x28   :  { %p1043_p2 = scmp.ne.s32.totalorder %s1379_s7, %s1042_s15  ;;  %p1046_p3 = scmp.lt.u32.totalorder %s1042_s15, %s1379_s7 }
  0x2a   :  { %p1048_p4 = pnand %p1046_p3, %p1043_p2 }
  0x2c   :  { %1051 = shalt.err (!%p1048_p4)
}
  0x2d   :  { %s1052_s0 = scalar_lea.vmem %s60_s26, 1024  ;;  %p1057_p6 = scmp.lt.s32.totalorder %s60_s26, %s60_s26 }
  0x2e   :  { %p1053_p5 = scmp.ne.s32.totalorder %s60_s26, %s1052_s0  ;;  %p1058_p7 = scmp.lt.s32.totalorder %s1052_s0, %s1052_s0 }
  0x30   :  { %p1059_p8 = por %p1058_p7, %p1057_p6 }
  0x32   :  { %p1060_p9 = pnand %p1059_p8, %p1053_p5 }
  0x34   :  { %1063 = shalt.err (!%p1060_p9)
}
  0x35   :  { %65 = dma.hbm_to_vmem [thread:$0]  %s1379_s7, 1024, %s60_s26, [#allocation6], %s1117_s27, %s1117_s27, %s1118_s28  }
  0x36   :  { %s1064_s24 = scalar_lea.hbm %s1381_s9, 1024 }
  0x37   :  { %p1065_p10 = scmp.ne.s32.totalorder %s1381_s9, %s1064_s24  ;;  %p1068_p11 = scmp.lt.u32.totalorder %s1064_s24, %s1381_s9 }
  0x39   :  { %p1070_p12 = pnand %p1068_p11, %p1065_p10 }
  0x3b   :  { %1073 = shalt.err (!%p1070_p12)
}
  0x3c   :  { %s1074_s15 = scalar_lea.vmem %s1215_s30, 1024  ;;  %p1079_p0 = scmp.lt.s32.totalorder %s1215_s30, %s1215_s30 }
  0x3d   :  { %p1075_p13 = scmp.ne.s32.totalorder %s1215_s30, %s1074_s15  ;;  %p1080_p1 = scmp.lt.s32.totalorder %s1074_s15, %s1074_s15 }
  0x3f   :  { %p1081_p2 = por %p1080_p1, %p1079_p0 }
  0x41   :  { %p1082_p3 = pnand %p1081_p2, %p1075_p13 }
  0x43   :  { %1085 = shalt.err (!%p1082_p3)
}
  0x44   :  { %79 = dma.hbm_to_vmem [thread:$0]  %s1381_s9, 1024, %s1215_s30, [#allocation9], %s1117_s27, %s1117_s27, %s1118_s28  }
  0x45   :  { %1108 = dma.done.wait [#allocation3], 512  }
  0x46   :  { %1109 = vsyncadd [#allocation3], 4294966784 }
  0x47   :  { %1110 = dma.done.wait [#allocation6], 2048  }
  0x48   :  { %1111 = vsyncadd [#allocation6], 4294965248 }
  0x49   :  { %1112 = dma.done.wait [#allocation9], 1024  }
  0x4a   :  { %1113 = vsyncadd [#allocation9], 4294966272  ;;  %v1252_v0 = vld [vmem:[#allocation2 + $0x10] sm:$0xff]  ;;  %v1254_v1 = vld [vmem:[#allocation2] sm:$0xff] }
  0x4b   :  { %v1256_v2 = vld [vmem:[#allocation2 + $0x18] sm:$0xff]  ;;  %105 = vadd.xlane.f32.xlu1 %v1252_v0  ;;  %101 = vadd.xlane.f32.xlu0 %v1254_v1  ;;  %v1260_v3 = vld [vmem:[#allocation2 + $0x8] sm:$0xff]  ;;  %v109_v5 = vmul.f32 %v1254_v1, %v1254_v1  ;;  %v111_v7 = vmul.f32 %v1252_v0, %v1252_v0  ;;  %v926_v8 = vld [vmem:[#allocation5] sm:$0xff]  }
  0x4c   :  { %v110_v4 = vmul.f32 %v1260_v3, %v1260_v3  ;;  %v112_v6 = vmul.f32 %v1256_v2, %v1256_v2  ;;  %857 = vmatprep.subr.bf16.mxu0 %v926_v8  ;;  %v927_v9 = vld [vmem:[#allocation5 + $0x8] sm:$0xff]   ;;  %v928_v10 = vld [vmem:[#allocation5 + $0x10] sm:$0xff]   ;;  %v929_v11 = vld [vmem:[#allocation5 + $0x18] sm:$0xff]  }
  0x4d   :  { %858 = vmatpush3.bf16.msra.mxu0 %v926_v8  ;;  %v930_v12 = vld [vmem:[#allocation5 + $0x20] sm:$0xff]   ;;  %v931_v13 = vld [vmem:[#allocation5 + $0x28] sm:$0xff]   ;;  %v932_v14 = vld [vmem:[#allocation5 + $0x30] sm:$0xff]  }
  0x4e   :  { %859 = vmatprep.subr.bf16.mxu0 %v927_v9  ;;  %v933_v15 = vld [vmem:[#allocation5 + $0x38] sm:$0xff]   ;;  %v796_v51 = vld [vmem:[%s1375_s3] ss:$0 sm:$0xff] }
  0x4f   :  { %107 = vadd.xlane.f32.xlu1 %v1256_v2  ;;  %103 = vadd.xlane.f32.xlu0 %v1260_v3  ;;  %v797_v54 = vld [vmem:[%s1376_s4] ss:$0 sm:$0xff] }
  0x50   :  { %v798_v8 = vld [vmem:[%s1374_s2] ss:$0 sm:$0xff] }
  0x51   :  { %860 = vmatpush3.bf16.msra.mxu0 %v927_v9 }
  0x52   :  { %861 = vmatprep.subr.bf16.mxu0 %v928_v10 }
  0x53   :  { %115 = vadd.xlane.f32.xlu1 %v110_v4  ;;  %113 = vadd.xlane.f32.xlu0 %v109_v5 }
  0x55   :  { %862 = vmatpush3.bf16.msra.mxu0 %v928_v10 }
  0x56   :  { %863 = vmatprep.subr.bf16.mxu0 %v929_v11 }
  0x57   :  { %119 = vadd.xlane.f32.xlu1 %v112_v6  ;;  %117 = vadd.xlane.f32.xlu0 %v111_v7 }
  0x59   :  { %864 = vmatpush3.bf16.msra.mxu0 %v929_v11 }
  0x5a   :  { %865 = vmatprep.subr.bf16.mxu0 %v930_v12 }
  0x5d   :  { %866 = vmatpush3.bf16.msra.mxu0 %v930_v12 }
  0x5e   :  { %867 = vmatprep.subr.bf16.mxu0 %v931_v13 }
  0x61   :  { %868 = vmatpush3.bf16.msra.mxu0 %v931_v13 }
  0x62   :  { %869 = vmatprep.subr.bf16.mxu0 %v932_v14 }
  0x65   :  { %870 = vmatpush3.bf16.msra.mxu0 %v932_v14 }
  0x66   :  { %871 = vmatprep.subr.bf16.mxu0 %v933_v15 }
  0x69   :  { %872 = vmatpush3.bf16.msra.mxu0 %v933_v15 }
  0xd8   :  { %v106_v16 = vpop.xlane.xlu1 %105  ;;  %v102_v17 = vpop.xlane.xlu0 %101 }
  0xd9   :  { %v121_v20 = vmul.f32 0.03125, %v102_v17  ;;  %v123_v22 = vmul.f32 0.03125, %v106_v16 }
  0xdb   :  { %v129_v26 = vmul.f32 %v121_v20, %v121_v20  ;;  %v131_v32 = vmul.f32 %v123_v22, %v123_v22  ;;  %v141_v50 = vsub.f32 %v1254_v1, %v121_v20  ;;  %v143_v59 = vsub.f32 %v1252_v0, %v123_v22 }
  0xdc   :  { %v108_v18 = vpop.xlane.xlu1 %107  ;;  %v104_v19 = vpop.xlane.xlu0 %103 }
  0xdd   :  { %v122_v21 = vmul.f32 0.03125, %v104_v19  ;;  %v124_v23 = vmul.f32 0.03125, %v108_v18 }
  0xdf   :  { %v130_v27 = vmul.f32 %v122_v21, %v122_v21  ;;  %v132_v33 = vmul.f32 %v124_v23, %v124_v23  ;;  %v142_v48 = vsub.f32 %v1260_v3, %v122_v21  ;;  %v144_v56 = vsub.f32 %v1256_v2, %v124_v23 }
  0xe0   :  { %v116_v24 = vpop.xlane.xlu1 %115  ;;  %v114_v25 = vpop.xlane.xlu0 %113 }
  0xe1   :  { %v126_v28 = vmul.f32 0.03125, %v116_v24  ;;  %v125_v29 = vmul.f32 0.03125, %v114_v25 }
  0xe3   :  { %v134_v30 = vsub.f32 %v126_v28, %v130_v27  ;;  %v133_v31 = vsub.f32 %v125_v29, %v129_v26 }
  0xe4   :  { %v120_v34 = vpop.xlane.xlu1 %119  ;;  %v118_v35 = vpop.xlane.xlu0 %117 }
  0xe5   :  { %v138_v36 = vmax.f32 %v134_v30, 0.0  ;;  %v137_v37 = vmax.f32 %v133_v31, 0.0  ;;  %v128_v38 = vmul.f32 0.03125, %v120_v34  ;;  %v127_v39 = vmul.f32 0.03125, %v118_v35 }
  0xe7   :  { %v146_v40 = vadd.f32 1e-05, %v138_v36  ;;  %v145_v41 = vadd.f32 1e-05, %v137_v37  ;;  %v136_v42 = vsub.f32 %v128_v38, %v132_v33  ;;  %v135_v43 = vsub.f32 %v127_v39, %v131_v32 }
  0xe9   :  { %950 = vrsqrt.f32 %v146_v40  ;;  %v140_v44 = vmax.f32 %v136_v42, 0.0  ;;  %v139_v45 = vmax.f32 %v135_v43, 0.0 }
  0xea   :  { %952 = vrsqrt.f32 %v145_v41 }
  0xeb   :  { %v148_v46 = vadd.f32 1e-05, %v140_v44  ;;  %v147_v47 = vadd.f32 1e-05, %v139_v45 }
  0xed   :  { %954 = vrsqrt.f32 %v148_v46 }
  0xee   :  { %956 = vrsqrt.f32 %v147_v47 }
  0xf3   :  { %v951_v49 = vpop.eup %950 }
  0xf4   :  { %v953_v52 = vpop.eup %952  ;;  %v154_v53 = vmul.f32 %v951_v49, %v142_v48 }
  0xf5   :  { %v153_v55 = vmul.f32 %v953_v52, %v141_v50 }
  0xf6   :  { %v164_v57 = vmul.f32 %v796_v51, %v154_v53 }
  0xf7   :  { %v955_v58 = vpop.eup %954  ;;  %v163_v60 = vmul.f32 %v796_v51, %v153_v55 }
  0xf8   :  { %v957_v61 = vpop.eup %956  ;;  %v1282_v62 = vadd.f32 %v797_v54, %v164_v57  ;;  %v156_v63 = vmul.f32 %v955_v58, %v144_v56 }
  0xf9   :  { %v1284_v1 = vadd.f32 %v797_v54, %v163_v60  ;;  %v155_v3 = vmul.f32 %v957_v61, %v143_v59 }
  0xfa   :  { %v166_v4 = vmul.f32 %v796_v51, %v156_v63 }
  0xfb   :  { %v177_v5 = vpack.c.bf16 %v1282_v62, %v1284_v1  ;;  %v165_v6 = vmul.f32 %v796_v51, %v155_v3 }
  0xfc   :  { %v1288_v7 = vadd.f32 %v797_v54, %v166_v4 }
  0xfd   :  { %873 = vmatprep.mubr.bf16.mxu0 %v177_v5  ;;  %v1290_v2 = vadd.f32 %v797_v54, %v165_v6 }
  0xff   :  { %v178_v0 = vpack.c.bf16 %v1288_v7, %v1290_v2 }
 0x101   :  { %874 = vmatmul.mubr.bf16.vlgmr.msra.gmra.mrb[0].mxu0 %v178_v0 }
 0x1d4   :  { %v875_v9 = vpop.f32.mrb[0].mxu0 }
 0x1d5   :  { %v293_v10 = vadd.f32 %v875_v9, %v798_v8  ;;  %v284_v11 = vpop.f32.mrb[1].mxu0 }
 0x1d6   :  { %v285_v12 = vadd.f32 %v798_v8, %v284_v11  ;;  %v876_v13 = vpop.f32.mrb[2].mxu0 }
 0x1d7   :  { %v311_v14 = vrot.slane %v293_v10, 4  ;;  %v296_v15 = vadd.f32 %v876_v13, %v798_v8  ;;  %v287_v16 = vpop.f32.mrb[3].mxu0 }
 0x1d8   :  { %v299_v17 = vrot.slane %v285_v12, 4  ;;  %v288_v18 = vadd.f32 %v798_v8, %v287_v16 }
 0x1d9   :  { %v312_v19 = vmax.f32 %v293_v10, %v311_v14  ;;  %v317_v20 = vrot.slane %v296_v15, 4 }
 0x1da   :  { %v300_v21 = vmax.f32 %v285_v12, %v299_v17  ;;  %v305_v22 = vrot.slane %v288_v18, 4 }
 0x1db   :  { %v313_v23 = vrot.slane %v312_v19, 2  ;;  %v318_v24 = vmax.f32 %v296_v15, %v317_v20 }
 0x1dc   :  { %v301_v25 = vrot.slane %v300_v21, 2  ;;  %v306_v26 = vmax.f32 %v288_v18, %v305_v22 }
 0x1dd   :  { %v314_v27 = vmax.f32 %v312_v19, %v313_v23  ;;  %v319_v28 = vrot.slane %v318_v24, 2 }
 0x1de   :  { %v302_v29 = vmax.f32 %v300_v21, %v301_v25  ;;  %v307_v30 = vrot.slane %v306_v26, 2 }
 0x1df   :  { %v315_v31 = vrot.slane %v314_v27, 1  ;;  %v320_v32 = vmax.f32 %v318_v24, %v319_v28 }
 0x1e0   :  { %v303_v33 = vrot.slane %v302_v29, 1  ;;  %v308_v34 = vmax.f32 %v306_v26, %v307_v30 }
 0x1e1   :  { %v316_v35 = vmax.f32 %v314_v27, %v315_v31  ;;  %v321_v36 = vrot.slane %v320_v32, 1 }
 0x1e2   :  { %v304_v37 = vmax.f32 %v302_v29, %v303_v33  ;;  %v309_v38 = vrot.slane %v308_v34, 1 }
 0x1e3   :  { %v325_v39 = vsub.f32 %v293_v10, %v316_v35  ;;  %v322_v40 = vmax.f32 %v320_v32, %v321_v36  ;;  %v936_v35 = vld [vmem:[#allocation7 + $0x10] sm:$0xff]   ;;  %v937_v36 = vld [vmem:[#allocation7 + $0x18] sm:$0xff]  }
 0x1e4   :  { %v323_v41 = vsub.f32 %v285_v12, %v304_v37  ;;  %v310_v42 = vmax.f32 %v308_v34, %v309_v38  ;;  %v935_v34 = vld [vmem:[#allocation7 + $0x8] sm:$0xff]   ;;  %v938_v37 = vld [vmem:[#allocation7 + $0x20] sm:$0xff]  }
 0x1e5   :  { %v331_v43 = vmul.f32 1.442695, %v325_v39  ;;  %v326_v44 = vsub.f32 %v296_v15, %v322_v40  ;;  %v939_v38 = vld [vmem:[#allocation7 + $0x28] sm:$0xff]   ;;  %v940_v39 = vld [vmem:[#allocation7 + $0x30] sm:$0xff]   ;;  %v941_v40 = vld [vmem:[#allocation7 + $0x38] sm:$0xff]  }
 0x1e6   :  { %v327_v45 = vmul.f32 1.442695, %v323_v41  ;;  %v324_v46 = vsub.f32 %v288_v18, %v310_v42 }
 0x1e7   :  { %958 = vpow2.f32 %v331_v43  ;;  %v333_v47 = vmul.f32 1.442695, %v326_v44 }
 0x1e8   :  { %960 = vpow2.f32 %v327_v45  ;;  %v329_v48 = vmul.f32 1.442695, %v324_v46 }
 0x1e9   :  { %962 = vpow2.f32 %v333_v47 }
 0x1ea   :  { %964 = vpow2.f32 %v329_v48 }
 0x1f1   :  { %v959_v49 = vpop.eup %958 }
 0x1f2   :  { %v961_v50 = vpop.eup %960  ;;  %v347_v51 = vrot.slane %v959_v49, 4 }
 0x1f3   :  { %v963_v52 = vpop.eup %962  ;;  %v335_v53 = vrot.slane %v961_v50, 4 }
 0x1f4   :  { %v965_v54 = vpop.eup %964  ;;  %v348_v55 = vadd.f32 %v959_v49, %v347_v51  ;;  %v353_v56 = vrot.slane %v963_v52, 4 }
 0x1f5   :  { %v336_v57 = vadd.f32 %v961_v50, %v335_v53  ;;  %v341_v58 = vrot.slane %v965_v54, 4 }
 0x1f6   :  { %v349_v59 = vrot.slane %v348_v55, 2  ;;  %v354_v60 = vadd.f32 %v963_v52, %v353_v56 }
 0x1f7   :  { %v337_v61 = vrot.slane %v336_v57, 2  ;;  %v342_v63 = vadd.f32 %v965_v54, %v341_v58 }
 0x1f8   :  { %v350_v3 = vadd.f32 %v349_v59, %v348_v55  ;;  %v355_v4 = vrot.slane %v354_v60, 2 }
 0x1f9   :  { %v338_v5 = vadd.f32 %v337_v61, %v336_v57  ;;  %v343_v6 = vrot.slane %v342_v63, 2 }
 0x1fa   :  { %v351_v0 = vrot.slane %v350_v3, 1  ;;  %v356_v8 = vadd.f32 %v355_v4, %v354_v60 }
 0x1fb   :  { %v339_v9 = vrot.slane %v338_v5, 1  ;;  %v344_v10 = vadd.f32 %v343_v6, %v342_v63 }
 0x1fc   :  { %v352_v11 = vadd.f32 %v351_v0, %v350_v3  ;;  %v357_v12 = vrot.slane %v356_v8, 1 }
 0x1fd   :  { %v340_v13 = vadd.f32 %v339_v9, %v338_v5  ;;  %v345_v14 = vrot.slane %v344_v10, 1 }
 0x1fe   :  { %966 = vrcp.f32 %v352_v11  ;;  %v358_v15 = vadd.f32 %v357_v12, %v356_v8 }
 0x1ff   :  { %968 = vrcp.f32 %v340_v13  ;;  %v346_v16 = vadd.f32 %v345_v14, %v344_v10 }
 0x200   :  { %970 = vrcp.f32 %v358_v15  ;;  %v807_v15 = vld [vmem:[%s1377_s5] ss:$0 sm:$0xff] }
 0x201   :  { %972 = vrcp.f32 %v346_v16 }
 0x208   :  { %v967_v17 = vpop.eup %966 }
 0x209   :  { %v969_v18 = vpop.eup %968  ;;  %v365_v19 = vmul.f32 %v967_v17, %v959_v49 }
 0x20a   :  { %v971_v20 = vpop.eup %970  ;;  %v363_v21 = vmul.f32 %v969_v18, %v961_v50 }
 0x20b   :  { %v973_v22 = vpop.eup %972  ;;  %v369_v23 = vmul.f32 %v365_v19, %v1290_v2  ;;  %v366_v24 = vmul.f32 %v971_v20, %v963_v52 }
 0x20c   :  { %v364_v25 = vmul.f32 %v973_v22, %v965_v54  ;;  %v367_v28 = vmul.f32 %v363_v21, %v1284_v1 }
 0x20d   :  { %v1299_v26 = vadd.f32 %v369_v23, %v1290_v2  ;;  %v370_v27 = vmul.f32 %v366_v24, %v1288_v7  ;;  %v808_v23 = vld [vmem:[%s1378_s6] ss:$0 sm:$0xff] }
 0x20e   :  { %v368_v30 = vmul.f32 %v364_v25, %v1282_v62  ;;  %v1310_v31 = vadd.f32 %v367_v28, %v1284_v1 }
 0x20f   :  { %381 = vadd.xlane.f32.xlu0 %v1299_v26  ;;  %v1305_v29 = vadd.f32 %v370_v27, %v1288_v7  ;;  %v387_v33 = vmul.f32 %v1299_v26, %v1299_v26 }
 0x210   :  { %v1314_v2 = vadd.f32 %v368_v30, %v1282_v62  ;;  %v385_v32 = vmul.f32 %v1310_v31, %v1310_v31  ;;  %v934_v62 = vld [vmem:[#allocation7] sm:$0xff]  }
 0x211   :  { %383 = vadd.xlane.f32.xlu1 %v1305_v29  ;;  %v388_v1 = vmul.f32 %v1305_v29, %v1305_v29  ;;  %877 = vmatprep.subr.bf16.mxu1 %v934_v62 }
 0x212   :  { %v386_v7 = vmul.f32 %v1314_v2, %v1314_v2  ;;  %878 = vmatpush3.bf16.msra.mxu1 %v934_v62  ;;  %v942_v62 = vld [vmem:[#allocation8] sm:$0xff]  }
 0x213   :  { %377 = vadd.xlane.f32.xlu0 %v1310_v31  ;;  %879 = vmatprep.subr.bf16.mxu1 %v935_v34 }
 0x214   :  { %897 = vmatprep.subr.bf16.mxu0 %v942_v62 }
 0x215   :  { %379 = vadd.xlane.f32.xlu1 %v1314_v2  ;;  %898 = vmatpush3.bf16.msra.mxu0 %v942_v62 }
 0x216   :  { %880 = vmatpush3.bf16.msra.mxu1 %v935_v34  ;;  %v943_v34 = vld [vmem:[#allocation8 + $0x8] sm:$0xff]  }
 0x217   :  { %389 = vadd.xlane.f32.xlu0 %v385_v32  ;;  %881 = vmatprep.subr.bf16.mxu1 %v936_v35 }
 0x218   :  { %899 = vmatprep.subr.bf16.mxu0 %v943_v34 }
 0x219   :  { %391 = vadd.xlane.f32.xlu1 %v386_v7  ;;  %900 = vmatpush3.bf16.msra.mxu0 %v943_v34 }
 0x21a   :  { %882 = vmatpush3.bf16.msra.mxu1 %v936_v35  ;;  %v944_v35 = vld [vmem:[#allocation8 + $0x10] sm:$0xff]  }
 0x21b   :  { %393 = vadd.xlane.f32.xlu0 %v387_v33  ;;  %883 = vmatprep.subr.bf16.mxu1 %v937_v36 }
 0x21c   :  { %901 = vmatprep.subr.bf16.mxu0 %v944_v35 }
 0x21d   :  { %395 = vadd.xlane.f32.xlu1 %v388_v1  ;;  %902 = vmatpush3.bf16.msra.mxu0 %v944_v35 }
 0x21e   :  { %884 = vmatpush3.bf16.msra.mxu1 %v937_v36  ;;  %v945_v36 = vld [vmem:[#allocation8 + $0x18] sm:$0xff]  }
 0x21f   :  { %885 = vmatprep.subr.bf16.mxu1 %v938_v37  ;;  %903 = vmatprep.subr.bf16.mxu0 %v945_v36 }
 0x221   :  { %904 = vmatpush3.bf16.msra.mxu0 %v945_v36 }
 0x222   :  { %886 = vmatpush3.bf16.msra.mxu1 %v938_v37  ;;  %v946_v37 = vld [vmem:[#allocation8 + $0x20] sm:$0xff]  }
 0x223   :  { %887 = vmatprep.subr.bf16.mxu1 %v939_v38  ;;  %905 = vmatprep.subr.bf16.mxu0 %v946_v37 }
 0x225   :  { %906 = vmatpush3.bf16.msra.mxu0 %v946_v37 }
 0x226   :  { %888 = vmatpush3.bf16.msra.mxu1 %v939_v38  ;;  %v947_v38 = vld [vmem:[#allocation8 + $0x28] sm:$0xff]  }
 0x227   :  { %889 = vmatprep.subr.bf16.mxu1 %v940_v39  ;;  %907 = vmatprep.subr.bf16.mxu0 %v947_v38 }
 0x229   :  { %908 = vmatpush3.bf16.msra.mxu0 %v947_v38 }
 0x22a   :  { %890 = vmatpush3.bf16.msra.mxu1 %v940_v39  ;;  %v948_v39 = vld [vmem:[#allocation8 + $0x30] sm:$0xff]  }
 0x22b   :  { %891 = vmatprep.subr.bf16.mxu1 %v941_v40  ;;  %909 = vmatprep.subr.bf16.mxu0 %v948_v39 }
 0x22d   :  { %910 = vmatpush3.bf16.msra.mxu0 %v948_v39 }
 0x22e   :  { %892 = vmatpush3.bf16.msra.mxu1 %v941_v40  ;;  %v949_v40 = vld [vmem:[#allocation8 + $0x38] sm:$0xff]  }
 0x22f   :  { %911 = vmatprep.subr.bf16.mxu0 %v949_v40 }
 0x231   :  { %912 = vmatpush3.bf16.msra.mxu0 %v949_v40 }
 0x29c   :  { %v382_v41 = vpop.xlane.xlu0 %381 }
 0x29d   :  { %v399_v48 = vmul.f32 0.03125, %v382_v41  ;;  %v809_v41 = vld [vmem:[%s1380_s8] ss:$0 sm:$0xff] }
 0x29e   :  { %v384_v42 = vpop.xlane.xlu1 %383 }
 0x29f   :  { %v400_v51 = vmul.f32 0.03125, %v384_v42  ;;  %v407_v57 = vmul.f32 %v399_v48, %v399_v48  ;;  %v419_v19 = vsub.f32 %v1299_v26, %v399_v48 }
 0x2a0   :  { %v378_v43 = vpop.xlane.xlu0 %377 }
 0x2a1   :  { %v397_v44 = vmul.f32 0.03125, %v378_v43  ;;  %v408_v61 = vmul.f32 %v400_v51, %v400_v51  ;;  %v420_v24 = vsub.f32 %v1305_v29, %v400_v51 }
 0x2a2   :  { %v380_v45 = vpop.xlane.xlu1 %379 }
 0x2a3   :  { %v398_v46 = vmul.f32 0.03125, %v380_v45  ;;  %v405_v49 = vmul.f32 %v397_v44, %v397_v44  ;;  %v417_v13 = vsub.f32 %v1310_v31, %v397_v44 }
 0x2a4   :  { %v390_v47 = vpop.xlane.xlu0 %389 }
 0x2a5   :  { %v401_v50 = vmul.f32 0.03125, %v390_v47  ;;  %v406_v53 = vmul.f32 %v398_v46, %v398_v46  ;;  %v418_v16 = vsub.f32 %v1314_v2, %v398_v46 }
 0x2a6   :  { %v392_v52 = vpop.xlane.xlu1 %391 }
 0x2a7   :  { %v409_v54 = vsub.f32 %v401_v50, %v405_v49  ;;  %v402_v55 = vmul.f32 0.03125, %v392_v52 }
 0x2a8   :  { %v394_v56 = vpop.xlane.xlu0 %393 }
 0x2a9   :  { %v413_v58 = vmax.f32 %v409_v54, 0.0  ;;  %v410_v59 = vsub.f32 %v402_v55, %v406_v53  ;;  %v403_v60 = vmul.f32 0.03125, %v394_v56 }
 0x2aa   :  { %v396_v63 = vpop.xlane.xlu1 %395 }
 0x2ab   :  { %v421_v3 = vadd.f32 1e-05, %v413_v58  ;;  %v414_v4 = vmax.f32 %v410_v59, 0.0  ;;  %v411_v5 = vsub.f32 %v403_v60, %v407_v57  ;;  %v404_v6 = vmul.f32 0.03125, %v396_v63 }
 0x2ad   :  { %974 = vrsqrt.f32 %v421_v3  ;;  %v422_v0 = vadd.f32 1e-05, %v414_v4  ;;  %v415_v8 = vmax.f32 %v411_v5, 0.0  ;;  %v412_v9 = vsub.f32 %v404_v6, %v408_v61 }
 0x2af   :  { %976 = vrsqrt.f32 %v422_v0  ;;  %v423_v10 = vadd.f32 1e-05, %v415_v8  ;;  %v416_v11 = vmax.f32 %v412_v9, 0.0 }
 0x2b1   :  { %978 = vrsqrt.f32 %v423_v10  ;;  %v424_v12 = vadd.f32 1e-05, %v416_v11 }
 0x2b3   :  { %980 = vrsqrt.f32 %v424_v12 }
 0x2b7   :  { %v975_v14 = vpop.eup %974 }
 0x2b8   :  { %v429_v17 = vmul.f32 %v975_v14, %v417_v13 }
 0x2b9   :  { %v977_v18 = vpop.eup %976 }
 0x2ba   :  { %v430_v20 = vmul.f32 %v977_v18, %v418_v16  ;;  %v439_v21 = vmul.f32 %v807_v15, %v429_v17 }
 0x2bb   :  { %v979_v22 = vpop.eup %978 }
 0x2bc   :  { %v440_v25 = vmul.f32 %v807_v15, %v430_v20  ;;  %v431_v27 = vmul.f32 %v979_v22, %v419_v19  ;;  %v1335_v30 = vadd.f32 %v808_v23, %v439_v21 }
 0x2bd   :  { %v981_v28 = vpop.eup %980 }
 0x2be   :  { %v1337_v31 = vadd.f32 %v808_v23, %v440_v25  ;;  %v432_v2 = vmul.f32 %v981_v28, %v420_v24  ;;  %v441_v32 = vmul.f32 %v807_v15, %v431_v27 }
 0x2c0   :  { %v453_v26 = vpack.c.bf16 %v1337_v31, %v1335_v30  ;;  %v442_v7 = vmul.f32 %v807_v15, %v432_v2  ;;  %v1341_v33 = vadd.f32 %v808_v23, %v441_v32  ;;  %v818_v2 = vld [vmem:[%s1382_s10] ss:$0 sm:$0xff]  ;;  %s1124_s10 = smov [#allocation10]  }
 0x2c1   :  { %s782_s0 = sshll.u32 %s1124_s10, 4  ;;  %s783_s0 = int_to_ptr.vmem [resolvable:$true] %s782_s0 }
 0x2c2   :  { %893 = vmatprep.mubr.bf16.mxu1 %v453_v26  ;;  %v1343_v1 = vadd.f32 %v808_v23, %v442_v7  ;;  %s1086_s13 = scalar_lea.vmem %s783_s0, 512  ;;  %p1091_p5 = scmp.lt.s32.totalorder %s783_s0, %s783_s0 }
 0x2c3   :  { %p1087_p4 = scmp.ne.s32.totalorder %s783_s0, %s1086_s13  ;;  %p1092_p6 = scmp.lt.s32.totalorder %s1086_s13, %s1086_s13 }
 0x2c4   :  { %v454_v29 = vpack.c.bf16 %v1343_v1, %v1341_v33 }
 0x2c5   :  { %p1093_p7 = por %p1092_p6, %p1091_p5 }
 0x2c6   :  { %894 = vmatmul.mubr.bf16.vlgmr.msra.gmra.mrb[0].mxu1 %v454_v29 }
 0x2c7   :  { %p1094_p8 = pnand %p1093_p7, %p1087_p4 }
 0x399   :  { %v895_v42 = vpop.f32.mrb[0].mxu1 }
 0x39a   :  { %v569_v43 = vadd.f32 %v895_v42, %v809_v41  ;;  %v560_v44 = vpop.f32.mrb[1].mxu1 }
 0x39b   :  { %v561_v45 = vadd.f32 %v809_v41, %v560_v44  ;;  %v896_v46 = vpop.f32.mrb[2].mxu1 }
 0x39c   :  { %v581_v47 = vmul.f32 0.044715, %v569_v43  ;;  %v572_v48 = vadd.f32 %v896_v46, %v809_v41  ;;  %v563_v49 = vpop.f32.mrb[3].mxu1  ;;  %v577_v16 = vmul.f32 0.5, %v569_v43 }
 0x39d   :  { %v579_v50 = vmul.f32 0.044715, %v561_v45  ;;  %v564_v51 = vadd.f32 %v809_v41, %v563_v49  ;;  %v575_v19 = vmul.f32 0.5, %v561_v45 }
 0x39e   :  { %v585_v52 = vmul.f32 %v581_v47, %v569_v43  ;;  %v582_v53 = vmul.f32 0.044715, %v572_v48  ;;  %v578_v17 = vmul.f32 0.5, %v572_v48 }
 0x39f   :  { %v583_v54 = vmul.f32 %v579_v50, %v561_v45  ;;  %v580_v55 = vmul.f32 0.044715, %v564_v51  ;;  %v576_v20 = vmul.f32 0.5, %v564_v51 }
 0x3a0   :  { %v589_v56 = vmul.f32 %v585_v52, %v569_v43  ;;  %v586_v57 = vmul.f32 %v582_v53, %v572_v48 }
 0x3a1   :  { %v587_v58 = vmul.f32 %v583_v54, %v561_v45  ;;  %v584_v59 = vmul.f32 %v580_v55, %v564_v51 }
 0x3a2   :  { %v593_v60 = vadd.f32 %v589_v56, %v569_v43  ;;  %v590_v61 = vmul.f32 %v586_v57, %v572_v48 }
 0x3a3   :  { %v588_v63 = vmul.f32 %v584_v59, %v564_v51  ;;  %v591_v3 = vadd.f32 %v587_v58, %v561_v45 }
 0x3a4   :  { %v597_v4 = vmul.f32 0.7978846, %v593_v60  ;;  %v594_v5 = vadd.f32 %v590_v61, %v572_v48 }
 0x3a5   :  { %v592_v6 = vadd.f32 %v588_v63, %v564_v51  ;;  %v595_v0 = vmul.f32 0.7978846, %v591_v3 }
 0x3a6   :  { %982 = vtanh.f32 %v597_v4  ;;  %v598_v8 = vmul.f32 0.7978846, %v594_v5 }
 0x3a7   :  { %v596_v9 = vmul.f32 0.7978846, %v592_v6  ;;  %984 = vtanh.f32 %v595_v0 }
 0x3a8   :  { %986 = vtanh.f32 %v598_v8 }
 0x3a9   :  { %988 = vtanh.f32 %v596_v9 }
 0x3b0   :  { %v983_v10 = vpop.eup %982 }
 0x3b1   :  { %v985_v11 = vpop.eup %984  ;;  %v605_v12 = vadd.f32 1.0, %v983_v10 }
 0x3b2   :  { %v987_v13 = vpop.eup %986  ;;  %v603_v14 = vadd.f32 1.0, %v985_v11 }
 0x3b3   :  { %v989_v15 = vpop.eup %988  ;;  %v606_v18 = vadd.f32 1.0, %v987_v13  ;;  %v609_v22 = vmul.f32 %v605_v12, %v577_v16 }
 0x3b4   :  { %v604_v21 = vadd.f32 1.0, %v989_v15  ;;  %v607_v24 = vmul.f32 %v603_v14, %v575_v19 }
 0x3b5   :  { %v610_v23 = vmul.f32 %v606_v18, %v578_v17 }
 0x3b6   :  { %v608_v25 = vmul.f32 %v604_v21, %v576_v20 }
 0x3b7   :  { %v612_v27 = vpack.c.bf16 %v610_v23, %v609_v22 }
 0x3b8   :  { %v611_v28 = vpack.c.bf16 %v608_v25, %v607_v24 }
 0x3ba   :  { %913 = vmatprep.mubr.bf16.mxu0 %v611_v28 }
 0x3bb   :  { %914 = vmatmul.mubr.bf16.vlgmr.msra.gmra.mrb[4].mxu0 %v612_v27 }
 0x48e   :  { %v915_v32 = vpop.f32.mrb[4].mxu0 }
 0x48f   :  { %v727_v26 = vadd.f32 %v915_v32, %v818_v2  ;;  %v718_v7 = vpop.f32.mrb[5].mxu0 }
 0x490   :  { %v719_v29 = vadd.f32 %v818_v2, %v718_v7  ;;  %v916_v62 = vpop.f32.mrb[6].mxu0 }
 0x491   :  { %v735_v34 = vadd.f32 %v727_v26, %v1341_v33  ;;  %v730_v35 = vadd.f32 %v916_v62, %v818_v2  ;;  %v721_v36 = vpop.f32.mrb[7].mxu0 }
 0x492   :  { %v733_v37 = vadd.f32 %v719_v29, %v1335_v30  ;;  %v722_v38 = vadd.f32 %v818_v2, %v721_v36 }
 0x493   :  { %v743_v39 = vmul.f32 0.044715, %v735_v34  ;;  %v736_v40 = vadd.f32 %v730_v35, %v1343_v1  ;;  %v739_v59 = vmul.f32 0.5, %v735_v34 }
 0x494   :  { %v741_v41 = vmul.f32 0.044715, %v733_v37  ;;  %v734_v42 = vadd.f32 %v722_v38, %v1337_v31  ;;  %v737_v63 = vmul.f32 0.5, %v733_v37 }
 0x495   :  { %v747_v43 = vmul.f32 %v743_v39, %v735_v34  ;;  %v744_v44 = vmul.f32 0.044715, %v736_v40  ;;  %v740_v5 = vmul.f32 0.5, %v736_v40 }
 0x496   :  { %v745_v45 = vmul.f32 %v741_v41, %v733_v37  ;;  %v742_v46 = vmul.f32 0.044715, %v734_v42  ;;  %v738_v8 = vmul.f32 0.5, %v734_v42 }
 0x497   :  { %v751_v47 = vmul.f32 %v747_v43, %v735_v34  ;;  %v748_v48 = vmul.f32 %v744_v44, %v736_v40 }
 0x498   :  { %v749_v49 = vmul.f32 %v745_v45, %v733_v37  ;;  %v746_v50 = vmul.f32 %v742_v46, %v734_v42 }
 0x499   :  { %v755_v33 = vadd.f32 %v751_v47, %v735_v34  ;;  %v752_v51 = vmul.f32 %v748_v48, %v736_v40 }
 0x49a   :  { %v753_v52 = vadd.f32 %v749_v49, %v733_v37  ;;  %v750_v53 = vmul.f32 %v746_v50, %v734_v42 }
 0x49b   :  { %v759_v30 = vmul.f32 0.7978846, %v755_v33  ;;  %v756_v54 = vadd.f32 %v752_v51, %v736_v40 }
 0x49c   :  { %v757_v55 = vmul.f32 0.7978846, %v753_v52  ;;  %v754_v56 = vadd.f32 %v750_v53, %v734_v42 }
 0x49d   :  { %v760_v1 = vmul.f32 0.7978846, %v756_v54  ;;  %990 = vtanh.f32 %v759_v30 }
 0x49e   :  { %v758_v57 = vmul.f32 0.7978846, %v754_v56  ;;  %992 = vtanh.f32 %v757_v55 }
 0x49f   :  { %994 = vtanh.f32 %v760_v1 }
 0x4a0   :  { %996 = vtanh.f32 %v758_v57 }
 0x4a7   :  { %v991_v31 = vpop.eup %990 }
 0x4a8   :  { %v993_v58 = vpop.eup %992  ;;  %v767_v60 = vadd.f32 1.0, %v991_v31 }
 0x4a9   :  { %v995_v61 = vpop.eup %994  ;;  %v765_v3 = vadd.f32 1.0, %v993_v58 }
 0x4aa   :  { %v997_v4 = vpop.eup %996  ;;  %v768_v6 = vadd.f32 1.0, %v995_v61  ;;  %v771_v0 = vmul.f32 %v767_v60, %v739_v59 }
 0x4ab   :  { %v766_v9 = vadd.f32 1.0, %v997_v4  ;;  %v769_v10 = vmul.f32 %v765_v3, %v737_v63 }
 0x4ac   :  { %v772_v11 = vmul.f32 %v768_v6, %v740_v5  ;;  %775 = vst [vmem:[#allocation10 + $0x10] sm:$0xff] %v771_v0 }
 0x4ad   :  { %v770_v12 = vmul.f32 %v766_v9, %v738_v8  ;;  %773 = vst [vmem:[#allocation10] sm:$0xff] %v769_v10 }
 0x4ae   :  { %776 = vst [vmem:[#allocation10 + $0x18] sm:$0xff] %v772_v11 }
 0x4af   :  { %774 = vst [vmem:[#allocation10 + $0x8] sm:$0xff] %v770_v12 }
 0x4b0   :  { %1097 = shalt.err (!%p1094_p8)
}
 0x4b1   :  { %s1098_s23 = scalar_lea.hbm %s1383_s11, 512 }
 0x4b2   :  { %p1099_p9 = scmp.ne.s32.totalorder %s1383_s11, %s1098_s23  ;;  %p1102_p10 = scmp.lt.u32.totalorder %s1098_s23, %s1383_s11 }
 0x4b4   :  { %p1104_p11 = pnand %p1102_p10, %p1099_p9 }
 0x4b6   :  { %1107 = shalt.err (!%p1104_p11)
}
 0x4b7   :  { %788 = dma.vmem_to_hbm [thread:$0]  %s783_s0, 512, %s1383_s11, [#allocation4], %s1120_s1, %s1120_s1, %s1121_s18  }
 0x4b8   :  { %1114 = dma.done.wait [#allocation4], 512  }
 0x4b9   :  { %1115 = vsyncadd [#allocation4], 4294966784 }
 0x4ba   :  { %792 = vsyncpa [#allocation3], 1 }
 0x4bb   :  { %793 = vsyncpa [#allocation6], 1 }
 0x4bc   :  { %794 = vsyncpa [#allocation9], 1 }
 0x4bd   :  { %795 = vsyncpa [#allocation4], 1 }

</bundles_post_ra>
